<compile_context>
chip_gen: v7x
topology: tpu7x:2x2x1
jax: 0.10.0
libtpu: 0.0.40
codegen_flags: <defaults>
</compile_context>

<pallas_src>
import math
from functools import partial

import jax
import jax.numpy as jnp
from jax.experimental import pallas as pl
from jax.experimental.pallas import tpu as pltpu


# ---------------------------------------------------------------------------
# Pallas kernel: time-chunked bidirectional LSTM recurrence.
# ---------------------------------------------------------------------------
def _bidir_lstm_kernel(*refs, collect_seq):
    """One time chunk of the bidirectional LSTM recurrence.

    gx_ref    : (Tc, 2Bp, 4H) -- x @ W_ih^T + b, gate order (i, f, o, g).
                Rows [0:Bp]  = forward direction at kernel step s.
                Rows [Bp:2Bp]= reverse direction (time axis pre-flipped).
    whh_*_ref : (H, 4H)       -- recurrent weights (fwd / rev), resident.
    out_f_ref : (Tc, Bp, H)   -- forward hidden (only if collect_seq).
    out_r_ref : (Tc, Bp, H)   -- reverse hidden; its BlockSpec index_map flips
                                 the chunk order so local index Tc-1-t lands at
                                 global original time index.
    hn_ref    : (2Bp, H) f32  -- final hidden; doubles as the carried h state.
    cn_ref    : (2Bp, H) f32  -- final cell;   doubles as the carried c state.
    """
    if collect_seq:
        gx_ref, whh_f_ref, whh_r_ref, out_f_ref, out_r_ref, hn_ref, cn_ref = refs
    else:
        gx_ref, whh_f_ref, whh_r_ref, hn_ref, cn_ref = refs
        out_f_ref = out_r_ref = None

    Tc, two_bp, G = gx_ref.shape
    Bp = two_bp // 2
    H = G // 4

    # Zero-init carried state at the first time chunk (hx=None in RNNBase_BB).
    @pl.when(pl.program_id(0) == 0)
    def _():
        hn_ref[...] = jnp.zeros_like(hn_ref)
        cn_ref[...] = jnp.zeros_like(cn_ref)

    whh_f = whh_f_ref[...]                     # (H, 4H), loaded once per chunk
    whh_r = whh_r_ref[...]
    mxu_dtype = whh_f.dtype

    def sigmoid(z):
        # tanh formulation keeps the transcendental on the EUP.
        return 0.5 * (jnp.tanh(0.5 * z) + 1.0)

    h = hn_ref[...]                            # (2Bp, H) f32 carried hidden
    c = cn_ref[...]                            # (2Bp, H) f32 carried cell

    # Tc is a small static chunk: bounded unroll (straight-line, static stores).
    for t in range(Tc):
        # Two dots, one per direction: every output column is consumed, and the
        # per-step (2B,4H) select of the old fused version is gone.
        rec_f = jnp.dot(h[:Bp].astype(mxu_dtype), whh_f,
                        preferred_element_type=jnp.float32)           # (Bp, 4H)
        rec_r = jnp.dot(h[Bp:].astype(mxu_dtype), whh_r,
                        preferred_element_type=jnp.float32)           # (Bp, 4H)
        gates = gx_ref[t].astype(jnp.float32) + jnp.concatenate(
            [rec_f, rec_r], axis=0)                                   # (2Bp, 4H) f32

        ifo = sigmoid(gates[:, :3 * H])        # one contiguous (2Bp, 3H) EUP slab
        g = jnp.tanh(gates[:, 3 * H:])         # (2Bp, H)
        i_g = ifo[:, 0 * H:1 * H]
        f_g = ifo[:, 1 * H:2 * H]
        o_g = ifo[:, 2 * H:3 * H]
        c = f_g * c + i_g * g
        h = o_g * jnp.tanh(c)

        if collect_seq:
            out_f_ref[t] = h[:Bp]              # forward hidden, local step t
            out_r_ref[Tc - 1 - t] = h[Bp:]     # reverse hidden (chunk is flipped)

    # Carried state written back into the resident h_n / c_n output blocks.
    hn_ref[...] = h
    cn_ref[...] = c


# ---------------------------------------------------------------------------
# Wrappers
# ---------------------------------------------------------------------------
@partial(jax.jit, static_argnames=("time_block", "compute_dtype", "collect_seq"))
def bidirectional_lstm_forward(x, params, *, time_block=8,
                               compute_dtype=jnp.float32, collect_seq=True):
    """Eval-mode RNNBase_BB forward (mode='LSTM', bidirectional, 1 layer, hx=None).

    x: (T, B, I) time-major input.
    Returns (output (T, B, 2H) or None, (h_n, c_n) each (2, B, H)).
    """
    T, B, I = x.shape
    w_ih_f, w_hh_f, bias_f, w_ih_b, w_hh_b, bias_b = params
    H = w_hh_f.shape[1]                        # w_hh_* : (4H, H)
    G = 4 * H

    # Reorder PyTorch gate rows (i, f, g, o) -> (i, f, o, g): the kernel then
    # applies sigmoid to one contiguous 3H slab and tanh to the trailing H.
    def reorder(w):
        return jnp.concatenate([w[:2 * H], w[3 * H:], w[2 * H:3 * H]], axis=0)

    w_ih_f, w_hh_f, bias_f = reorder(w_ih_f), reorder(w_hh_f), reorder(bias_f)
    w_ih_b, w_hh_b, bias_b = reorder(w_ih_b), reorder(w_hh_b), reorder(bias_b)

    # Hoisted input projection: one (T*B, I) @ (I, 8H) matmul for both directions.
    w_ih_cat = jnp.concatenate([w_ih_f.T, w_ih_b.T], axis=1)            # (I, 8H)
    gx = (x.reshape(T * B, I) @ w_ih_cat).reshape(T, B, 2 * G)
    gx_f = gx[..., :G] + bias_f                                          # (T, B, 4H)
    gx_r = (gx[..., G:] + bias_b)[::-1]        # reverse stream, pre-flipped in time

    # Pad batch to a sublane multiple and time (at the FRONT) to a multiple of
    # the chunk; zero gate pre-activations keep h = c = 0 through pad steps.
    Bp = max(8, ((B + 7) // 8) * 8)
    Tc = int(time_block)
    Tp = ((T + Tc - 1) // Tc) * Tc
    pad_t, pad_b = Tp - T, Bp - B

    def pad(a):
        return jnp.pad(a, ((pad_t, 0), (0, pad_b), (0, 0)))

    gx_packed = jnp.concatenate([pad(gx_f), pad(gx_r)], axis=1)          # (Tp, 2Bp, 4H)
    gx_packed = gx_packed.astype(compute_dtype)
    whh_f_t = w_hh_f.T.astype(compute_dtype)                             # (H, 4H)
    whh_r_t = w_hh_b.T.astype(compute_dtype)                             # (H, 4H)

    nt = Tp // Tc

    out_shape, out_specs = [], []
    if collect_seq:
        # TODO(synk): for H not a multiple of 128, pad H so the sequence stores
        # are lane-dense (unmasked vst); at typical H >= 128 this is automatic.
        out_shape += [jax.ShapeDtypeStruct((Tp, Bp, H), jnp.float32),
                      jax.ShapeDtypeStruct((Tp, Bp, H), jnp.float32)]
        out_specs += [pl.BlockSpec((Tc, Bp, H), lambda i: (i, 0, 0)),
                      pl.BlockSpec((Tc, Bp, H), lambda i: (nt - 1 - i, 0, 0))]
    # h_n / c_n double as the carried recurrent state (resident output blocks).
    out_shape += [jax.ShapeDtypeStruct((2 * Bp, H), jnp.float32),
                  jax.ShapeDtypeStruct((2 * Bp, H), jnp.float32)]
    out_specs += [pl.BlockSpec((2 * Bp, H), lambda i: (0, 0)),
                  pl.BlockSpec((2 * Bp, H), lambda i: (0, 0))]

    results = pl.pallas_call(
        partial(_bidir_lstm_kernel, collect_seq=collect_seq),
        out_shape=tuple(out_shape),
        grid_spec=pltpu.PrefetchScalarGridSpec(
            num_scalar_prefetch=0,
            grid=(nt,),
            in_specs=[
                pl.BlockSpec((Tc, 2 * Bp, G), lambda i: (i, 0, 0)),   # streamed gx
                pl.BlockSpec((H, G), lambda i: (0, 0)),               # whh fwd (resident)
                pl.BlockSpec((H, G), lambda i: (0, 0)),               # whh rev (resident)
            ],
            out_specs=tuple(out_specs),
        ),
        compiler_params=pltpu.CompilerParams(
            dimension_semantics=("arbitrary",),          # sequential recurrence
            vmem_limit_bytes=64 * 1024 * 1024,           # sized for v7x's 64 MiB
        ),
    )(gx_packed, whh_f_t, whh_r_t)

    if collect_seq:
        out_f_p, out_r_p, hn_p, cn_p = results
        out_f = out_f_p[pad_t:, :B, :]         # drop front time pad / batch pad
        out_r = out_r_p[:T, :B, :]             # rev stream: real steps land in [0, T)
        output = jnp.concatenate([out_f, out_r], axis=-1)               # (T, B, 2H)
    else:
        hn_p, cn_p = results
        output = None

    h_n = hn_p.reshape(2, Bp, H)[:, :B, :]     # rows [0:Bp]=fwd, [Bp:2Bp]=rev
    c_n = cn_p.reshape(2, Bp, H)[:, :B, :]
    return output, (h_n, c_n)


def encoder_rnn_bb_forward(words, embedding, lstm_params, input_lengths=None,
                           *, compute_dtype=jnp.float32):
    """EncoderRNN_BB.forward in eval mode (weights = means, dropout p=0).

    words: (B, T) int32 token ids.
    Returns (B, 2H) == hidden[0].transpose(0, 1).contiguous().view(B, -1).
    """
    del input_lengths  # TODO(synk): pack_padded_sequence length masking not modeled
    B, T = words.shape
    embedded = jnp.take(embedding, words, axis=0)          # (B, T, E)
    x = jnp.transpose(embedded, (1, 0, 2))                 # (T, B, E) time-major
    # Encoder only consumes h_n: skip the (T, B, 2H) sequence output entirely.
    _, (h_n, _) = bidirectional_lstm_forward(
        x, lstm_params, time_block=8, compute_dtype=compute_dtype,
        collect_seq=False)
    return jnp.transpose(h_n, (1, 0, 2)).reshape(B, -1)    # (B, 2H)


# ---------------------------------------------------------------------------
# Parameter init (matches reset_parameters(): uniform(-stdv, stdv) means) and
# a pure-JAX reference for correctness checking.
# ---------------------------------------------------------------------------
def _init_params(key, input_size, hidden_size):
    stdv = 1.0 / math.sqrt(hidden_size)
    G = 4 * hidden_size
    keys = jax.random.split(key, 8)

    def u(k, shape):
        return jax.random.uniform(k, shape, jnp.float32, -stdv, stdv)

    w_ih_f = u(keys[0], (G, input_size))
    w_hh_f = u(keys[1], (G, hidden_size))
    b_ih_f = u(keys[2], (G,))
    b_hh_f = u(keys[3], (G,))
    w_ih_b = u(keys[4], (G, input_size))
    w_hh_b = u(keys[5], (G, hidden_size))
    b_ih_b = u(keys[6], (G,))
    b_hh_b = u(keys[7], (G,))
    return (w_ih_f, w_hh_f, b_ih_f + b_hh_f,
            w_ih_b, w_hh_b, b_ih_b + b_hh_b)


def _reference_lstm(x, params):
    """Pure-JAX reference (lax.scan) for the bidirectional LSTM (PyTorch order)."""
    w_ih_f, w_hh_f, bias_f, w_ih_b, w_hh_b, bias_b = params
    H = w_hh_f.shape[1]
    B = x.shape[1]

    def make_step(w_ih, w_hh, b):
        def step(carry, xt):
            h, c = carry
            gates = xt @ w_ih.T + h @ w_hh.T + b
            i = jax.nn.sigmoid(gates[:, 0 * H:1 * H])
            f = jax.nn.sigmoid(gates[:, 1 * H:2 * H])
            g = jnp.tanh(gates[:, 2 * H:3 * H])
            o = jax.nn.sigmoid(gates[:, 3 * H:4 * H])
            c = f * c + i * g
            h = o * jnp.tanh(c)
            return (h, c), h
        return step

    h0 = jnp.zeros((B, H), jnp.float32)
    c0 = jnp.zeros((B, H), jnp.float32)
    (hf, cf), out_f = jax.lax.scan(make_step(w_ih_f, w_hh_f, bias_f), (h0, c0), x)
    (hb, cb), out_b_rev = jax.lax.scan(make_step(w_ih_b, w_hh_b, bias_b),
                                       (h0, c0), x[::-1])
    out_b = out_b_rev[::-1]
    output = jnp.concatenate([out_f, out_b], axis=-1)
    h_n = jnp.stack([hf, hb], axis=0)
    c_n = jnp.stack([cf, cb], axis=0)
    return output, (h_n, c_n)


if __name__ == "__main__":
    # Small shapes consistent with the module: vocab=16, embedding=16,
    # hidden=32, batch=2, seq_len=8.
    V, E, H, B, T = 16, 16, 32, 2, 8

    key = jax.random.PRNGKey(0)
    k_words, k_emb, k_params = jax.random.split(key, 3)
    words = jax.random.randint(k_words, (B, T), 0, V, dtype=jnp.int32)
    embedding = 0.1 * jax.random.normal(k_emb, (V, E), jnp.float32)
    params = _init_params(k_params, E, H)
    input_lengths = jnp.full((B,), T, jnp.int32)   # full-length sequences

    x = jnp.transpose(jnp.take(embedding, words, axis=0), (1, 0, 2))  # (T, B, E)

    # Pure-JAX reference.
    ref_out, (ref_hn, ref_cn) = _reference_lstm(x, params)
    ref_enc = jnp.transpose(ref_hn, (1, 0, 2)).reshape(B, -1)

    # 1) f32, full sequence, multi-chunk grid (T=8, Tc=4 -> 2 time chunks).
    out, (h_n, c_n) = bidirectional_lstm_forward(
        x, params, time_block=4, compute_dtype=jnp.float32, collect_seq=True)
    jax.block_until_ready((out, h_n, c_n))
    assert out.shape == (T, B, 2 * H)
    assert h_n.shape == (2, B, H) and c_n.shape == (2, B, H)
    assert jnp.allclose(out, ref_out, atol=1e-4, rtol=1e-4)
    assert jnp.allclose(h_n, ref_hn, atol=1e-4, rtol=1e-4)
    assert jnp.allclose(c_n, ref_cn, atol=1e-4, rtol=1e-4)

    # 2) f32, chunk size that does NOT divide T (exercises front time padding).
    out3, (h_n3, c_n3) = bidirectional_lstm_forward(
        x, params, time_block=3, compute_dtype=jnp.float32, collect_seq=True)
    jax.block_until_ready((out3, h_n3, c_n3))
    assert jnp.allclose(out3, ref_out, atol=1e-4, rtol=1e-4)
    assert jnp.allclose(h_n3, ref_hn, atol=1e-4, rtol=1e-4)
    assert jnp.allclose(c_n3, ref_cn, atol=1e-4, rtol=1e-4)

    # 3) bf16 MXU / streamed-gx path (f32 carry and gate math), looser tolerance.
    out_bf, (h_n_bf, _) = bidirectional_lstm_forward(
        x, params, time_block=4, compute_dtype=jnp.bfloat16, collect_seq=True)
    jax.block_until_ready((out_bf, h_n_bf))
    assert jnp.allclose(out_bf, ref_out, atol=3e-2, rtol=3e-2)
    assert jnp.allclose(h_n_bf, ref_hn, atol=3e-2, rtol=3e-2)

    # 4) Encoder forward (h_n only; sequence outputs skipped inside the kernel).
    enc_out = encoder_rnn_bb_forward(words, embedding, params, input_lengths)
    jax.block_until_ready(enc_out)
    assert enc_out.shape == (B, 2 * H)
    assert jnp.allclose(enc_out, ref_enc, atol=1e-4, rtol=1e-4)

    print("KERNEL_OK")
</pallas_src>

<mosaic_0001>
module attributes {stable_mosaic.version = 11 : i64} {
  func.func @_bidir_lstm_kernel(%arg0: i32, %arg1: memref<4x16x128xf32, #tpu.memory_space<vmem>>, %arg2: memref<32x128xf32, #tpu.memory_space<vmem>>, %arg3: memref<32x128xf32, #tpu.memory_space<vmem>>, %arg4: memref<4x8x32xf32, #tpu.memory_space<vmem>>, %arg5: memref<4x8x32xf32, #tpu.memory_space<vmem>>, %arg6: memref<16x32xf32, #tpu.memory_space<vmem>>, %arg7: memref<16x32xf32, #tpu.memory_space<vmem>>) attributes {dimension_semantics = [#tpu.dimension_semantics<arbitrary>], iteration_bounds = array<i64: 2>, scalar_prefetch = 0 : i64, scratch_operands = 0 : i64, tpu.core_type = #tpu.core_type<tc>, window_params = [{transform_indices = @transform_0, window_bounds = array<i64: 4, 16, 128>}, {pipeline_mode = #tpu.pipeline_mode<synchronous>, transform_indices = @transform_1, window_bounds = array<i64: 32, 128>}, {pipeline_mode = #tpu.pipeline_mode<synchronous>, transform_indices = @transform_2, window_bounds = array<i64: 32, 128>}, {transform_indices = @transform_3, window_bounds = array<i64: 4, 8, 32>}, {transform_indices = @transform_4, window_bounds = array<i64: 4, 8, 32>}, {pipeline_mode = #tpu.pipeline_mode<synchronous>, transform_indices = @transform_5, window_bounds = array<i64: 16, 32>}, {pipeline_mode = #tpu.pipeline_mode<synchronous>, transform_indices = @transform_6, window_bounds = array<i64: 16, 32>}]} {
    %c0_i32 = arith.constant 0 : i32
    %0 = arith.cmpi eq, %arg0, %c0_i32 : i32
    %1 = arith.extui %0 : i1 to i32
    %c0_i32_0 = arith.constant 0 : i32
    %2 = arith.cmpi ne, %1, %c0_i32_0 : i32
    scf.if %2 {
      %cst_64 = arith.constant 0.000000e+00 : f32
      %145 = vector.broadcast %cst_64 : f32 to vector<16x32xf32>
      %c0_65 = arith.constant 0 : index
      %c0_66 = arith.constant 0 : index
      %146 = vector.load %arg6[%c0_65, %c0_66] : memref<16x32xf32, #tpu.memory_space<vmem>>, vector<16x32xf32>
      tpu.vector_store %arg6[%c0_65, %c0_66], %145 {strides = array<i32>} : memref<16x32xf32, #tpu.memory_space<vmem>>, vector<16x32xf32>,
      %cst_67 = arith.constant 0.000000e+00 : f32
      %147 = vector.broadcast %cst_67 : f32 to vector<16x32xf32>
      %c0_68 = arith.constant 0 : index
      %c0_69 = arith.constant 0 : index
      %148 = vector.load %arg7[%c0_68, %c0_69] : memref<16x32xf32, #tpu.memory_space<vmem>>, vector<16x32xf32>
      tpu.vector_store %arg7[%c0_68, %c0_69], %147 {strides = array<i32>} : memref<16x32xf32, #tpu.memory_space<vmem>>, vector<16x32xf32>,
    } else {
    }
    %c0 = arith.constant 0 : index
    %c0_1 = arith.constant 0 : index
    %3 = vector.load %arg2[%c0, %c0_1] : memref<32x128xf32, #tpu.memory_space<vmem>>, vector<32x128xf32>
    %c0_2 = arith.constant 0 : index
    %c0_3 = arith.constant 0 : index
    %4 = vector.load %arg3[%c0_2, %c0_3] : memref<32x128xf32, #tpu.memory_space<vmem>>, vector<32x128xf32>
    %c0_4 = arith.constant 0 : index
    %c0_5 = arith.constant 0 : index
    %5 = vector.load %arg6[%c0_4, %c0_5] : memref<16x32xf32, #tpu.memory_space<vmem>>, vector<16x32xf32>
    %c0_6 = arith.constant 0 : index
    %c0_7 = arith.constant 0 : index
    %6 = vector.load %arg7[%c0_6, %c0_7] : memref<16x32xf32, #tpu.memory_space<vmem>>, vector<16x32xf32>
    %7 = vector.extract_strided_slice %5 {offsets = [0, 0], sizes = [8, 32], strides = [1, 1]} : vector<16x32xf32> to vector<8x32xf32>
    %cst = arith.constant dense<0.000000e+00> : vector<8x128xf32>
    %8 = tpu.matmul %7, %3, %cst {dimension_numbers = #tpu.dot_dimension_numbers<[1], [0], [0], [1], [0, 0, 1, 1], [], []>} : vector<8x32xf32>, vector<32x128xf32>, vector<8x128xf32> -> vector<8x128xf32>
    %9 = vector.extract_strided_slice %5 {offsets = [8, 0], sizes = [8, 32], strides = [1, 1]} : vector<16x32xf32> to vector<8x32xf32>
    %cst_8 = arith.constant dense<0.000000e+00> : vector<8x128xf32>
    %10 = tpu.matmul %9, %4, %cst_8 {dimension_numbers = #tpu.dot_dimension_numbers<[1], [0], [0], [1], [0, 0, 1, 1], [], []>} : vector<8x32xf32>, vector<32x128xf32>, vector<8x128xf32> -> vector<8x128xf32>
    %c0_9 = arith.constant 0 : index
    %c0_10 = arith.constant 0 : index
    %c0_11 = arith.constant 0 : index
    %11 = vector.load %arg1[%c0_9, %c0_10, %c0_11] : memref<4x16x128xf32, #tpu.memory_space<vmem>>, vector<1x16x128xf32>
    %12 = vector.shape_cast %11 : vector<1x16x128xf32> to vector<16x128xf32>
    %13 = tpu.concatenate %8, %10 in 0 : vector<8x128xf32>, vector<8x128xf32> -> vector<16x128xf32>
    %14 = arith.addf %12, %13 : vector<16x128xf32>
    %15 = vector.extract_strided_slice %14 {offsets = [0, 0], sizes = [16, 96], strides = [1, 1]} : vector<16x128xf32> to vector<16x96xf32>
    %cst_12 = arith.constant 5.000000e-01 : f32
    %16 = vector.broadcast %cst_12 : f32 to vector<16x96xf32>
    %17 = arith.mulf %16, %15 : vector<16x96xf32>
    %18 = math.tanh %17 : vector<16x96xf32>
    %cst_13 = arith.constant 1.000000e+00 : f32
    %19 = vector.broadcast %cst_13 : f32 to vector<16x96xf32>
    %20 = arith.addf %18, %19 : vector<16x96xf32>
    %cst_14 = arith.constant 5.000000e-01 : f32
    %21 = vector.broadcast %cst_14 : f32 to vector<16x96xf32>
    %22 = arith.mulf %21, %20 : vector<16x96xf32>
    %23 = vector.extract_strided_slice %14 {offsets = [0, 96], sizes = [16, 32], strides = [1, 1]} : vector<16x128xf32> to vector<16x32xf32>
    %24 = math.tanh %23 : vector<16x32xf32>
    %25 = vector.extract_strided_slice %22 {offsets = [0, 0], sizes = [16, 32], strides = [1, 1]} : vector<16x96xf32> to vector<16x32xf32>
    %26 = vector.extract_strided_slice %22 {offsets = [0, 32], sizes = [16, 32], strides = [1, 1]} : vector<16x96xf32> to vector<16x32xf32>
    %27 = vector.extract_strided_slice %22 {offsets = [0, 64], sizes = [16, 32], strides = [1, 1]} : vector<16x96xf32> to vector<16x32xf32>
    %28 = arith.mulf %26, %6 : vector<16x32xf32>
    %29 = arith.mulf %25, %24 : vector<16x32xf32>
    %30 = arith.addf %28, %29 : vector<16x32xf32>
    %31 = math.tanh %30 : vector<16x32xf32>
    %32 = arith.mulf %27, %31 : vector<16x32xf32>
    %33 = vector.extract_strided_slice %32 {offsets = [0, 0], sizes = [8, 32], strides = [1, 1]} : vector<16x32xf32> to vector<8x32xf32>
    %c0_15 = arith.constant 0 : index
    %c0_16 = arith.constant 0 : index
    %c0_17 = arith.constant 0 : index
    %34 = vector.load %arg4[%c0_15, %c0_16, %c0_17] : memref<4x8x32xf32, #tpu.memory_space<vmem>>, vector<1x8x32xf32>
    %35 = vector.shape_cast %34 : vector<1x8x32xf32> to vector<8x32xf32>
    %36 = vector.shape_cast %33 : vector<8x32xf32> to vector<1x8x32xf32>
    tpu.vector_store %arg4[%c0_15, %c0_16, %c0_17], %36 {strides = array<i32>} : memref<4x8x32xf32, #tpu.memory_space<vmem>>, vector<1x8x32xf32>,
    %37 = vector.extract_strided_slice %32 {offsets = [8, 0], sizes = [8, 32], strides = [1, 1]} : vector<16x32xf32> to vector<8x32xf32>
    %c3 = arith.constant 3 : index
    %c0_18 = arith.constant 0 : index
    %c0_19 = arith.constant 0 : index
    %38 = vector.load %arg5[%c3, %c0_18, %c0_19] : memref<4x8x32xf32, #tpu.memory_space<vmem>>, vector<1x8x32xf32>
    %39 = vector.shape_cast %38 : vector<1x8x32xf32> to vector<8x32xf32>
    %40 = vector.shape_cast %37 : vector<8x32xf32> to vector<1x8x32xf32>
    tpu.vector_store %arg5[%c3, %c0_18, %c0_19], %40 {strides = array<i32>} : memref<4x8x32xf32, #tpu.memory_space<vmem>>, vector<1x8x32xf32>,
    %41 = vector.extract_strided_slice %32 {offsets = [0, 0], sizes = [8, 32], strides = [1, 1]} : vector<16x32xf32> to vector<8x32xf32>
    %cst_20 = arith.constant dense<0.000000e+00> : vector<8x128xf32>
    %42 = tpu.matmul %41, %3, %cst_20 {dimension_numbers = #tpu.dot_dimension_numbers<[1], [0], [0], [1], [0, 0, 1, 1], [], []>} : vector<8x32xf32>, vector<32x128xf32>, vector<8x128xf32> -> vector<8x128xf32>
    %43 = vector.extract_strided_slice %32 {offsets = [8, 0], sizes = [8, 32], strides = [1, 1]} : vector<16x32xf32> to vector<8x32xf32>
    %cst_21 = arith.constant dense<0.000000e+00> : vector<8x128xf32>
    %44 = tpu.matmul %43, %4, %cst_21 {dimension_numbers = #tpu.dot_dimension_numbers<[1], [0], [0], [1], [0, 0, 1, 1], [], []>} : vector<8x32xf32>, vector<32x128xf32>, vector<8x128xf32> -> vector<8x128xf32>
    %c1 = arith.constant 1 : index
    %c0_22 = arith.constant 0 : index
    %c0_23 = arith.constant 0 : index
    %45 = vector.load %arg1[%c1, %c0_22, %c0_23] : memref<4x16x128xf32, #tpu.memory_space<vmem>>, vector<1x16x128xf32>
    %46 = vector.shape_cast %45 : vector<1x16x128xf32> to vector<16x128xf32>
    %47 = tpu.concatenate %42, %44 in 0 : vector<8x128xf32>, vector<8x128xf32> -> vector<16x128xf32>
    %48 = arith.addf %46, %47 : vector<16x128xf32>
    %49 = vector.extract_strided_slice %48 {offsets = [0, 0], sizes = [16, 96], strides = [1, 1]} : vector<16x128xf32> to vector<16x96xf32>
    %cst_24 = arith.constant 5.000000e-01 : f32
    %50 = vector.broadcast %cst_24 : f32 to vector<16x96xf32>
    %51 = arith.mulf %50, %49 : vector<16x96xf32>
    %52 = math.tanh %51 : vector<16x96xf32>
    %cst_25 = arith.constant 1.000000e+00 : f32
    %53 = vector.broadcast %cst_25 : f32 to vector<16x96xf32>
    %54 = arith.addf %52, %53 : vector<16x96xf32>
    %cst_26 = arith.constant 5.000000e-01 : f32
    %55 = vector.broadcast %cst_26 : f32 to vector<16x96xf32>
    %56 = arith.mulf %55, %54 : vector<16x96xf32>
    %57 = vector.extract_strided_slice %48 {offsets = [0, 96], sizes = [16, 32], strides = [1, 1]} : vector<16x128xf32> to vector<16x32xf32>
    %58 = math.tanh %57 : vector<16x32xf32>
    %59 = vector.extract_strided_slice %56 {offsets = [0, 0], sizes = [16, 32], strides = [1, 1]} : vector<16x96xf32> to vector<16x32xf32>
    %60 = vector.extract_strided_slice %56 {offsets = [0, 32], sizes = [16, 32], strides = [1, 1]} : vector<16x96xf32> to vector<16x32xf32>
    %61 = vector.extract_strided_slice %56 {offsets = [0, 64], sizes = [16, 32], strides = [1, 1]} : vector<16x96xf32> to vector<16x32xf32>
    %62 = arith.mulf %60, %30 : vector<16x32xf32>
    %63 = arith.mulf %59, %58 : vector<16x32xf32>
    %64 = arith.addf %62, %63 : vector<16x32xf32>
    %65 = math.tanh %64 : vector<16x32xf32>
    %66 = arith.mulf %61, %65 : vector<16x32xf32>
    %67 = vector.extract_strided_slice %66 {offsets = [0, 0], sizes = [8, 32], strides = [1, 1]} : vector<16x32xf32> to vector<8x32xf32>
    %c1_27 = arith.constant 1 : index
    %c0_28 = arith.constant 0 : index
    %c0_29 = arith.constant 0 : index
    %68 = vector.load %arg4[%c1_27, %c0_28, %c0_29] : memref<4x8x32xf32, #tpu.memory_space<vmem>>, vector<1x8x32xf32>
    %69 = vector.shape_cast %68 : vector<1x8x32xf32> to vector<8x32xf32>
    %70 = vector.shape_cast %67 : vector<8x32xf32> to vector<1x8x32xf32>
    tpu.vector_store %arg4[%c1_27, %c0_28, %c0_29], %70 {strides = array<i32>} : memref<4x8x32xf32, #tpu.memory_space<vmem>>, vector<1x8x32xf32>,
    %71 = vector.extract_strided_slice %66 {offsets = [8, 0], sizes = [8, 32], strides = [1, 1]} : vector<16x32xf32> to vector<8x32xf32>
    %c2 = arith.constant 2 : index
    %c0_30 = arith.constant 0 : index
    %c0_31 = arith.constant 0 : index
    %72 = vector.load %arg5[%c2, %c0_30, %c0_31] : memref<4x8x32xf32, #tpu.memory_space<vmem>>, vector<1x8x32xf32>
    %73 = vector.shape_cast %72 : vector<1x8x32xf32> to vector<8x32xf32>
    %74 = vector.shape_cast %71 : vector<8x32xf32> to vector<1x8x32xf32>
    tpu.vector_store %arg5[%c2, %c0_30, %c0_31], %74 {strides = array<i32>} : memref<4x8x32xf32, #tpu.memory_space<vmem>>, vector<1x8x32xf32>,
    %75 = vector.extract_strided_slice %66 {offsets = [0, 0], sizes = [8, 32], strides = [1, 1]} : vector<16x32xf32> to vector<8x32xf32>
    %cst_32 = arith.constant dense<0.000000e+00> : vector<8x128xf32>
    %76 = tpu.matmul %75, %3, %cst_32 {dimension_numbers = #tpu.dot_dimension_numbers<[1], [0], [0], [1], [0, 0, 1, 1], [], []>} : vector<8x32xf32>, vector<32x128xf32>, vector<8x128xf32> -> vector<8x128xf32>
    %77 = vector.extract_strided_slice %66 {offsets = [8, 0], sizes = [8, 32], strides = [1, 1]} : vector<16x32xf32> to vector<8x32xf32>
    %cst_33 = arith.constant dense<0.000000e+00> : vector<8x128xf32>
    %78 = tpu.matmul %77, %4, %cst_33 {dimension_numbers = #tpu.dot_dimension_numbers<[1], [0], [0], [1], [0, 0, 1, 1], [], []>} : vector<8x32xf32>, vector<32x128xf32>, vector<8x128xf32> -> vector<8x128xf32>
    %c2_34 = arith.constant 2 : index
    %c0_35 = arith.constant 0 : index
    %c0_36 = arith.constant 0 : index
    %79 = vector.load %arg1[%c2_34, %c0_35, %c0_36] : memref<4x16x128xf32, #tpu.memory_space<vmem>>, vector<1x16x128xf32>
    %80 = vector.shape_cast %79 : vector<1x16x128xf32> to vector<16x128xf32>
    %81 = tpu.concatenate %76, %78 in 0 : vector<8x128xf32>, vector<8x128xf32> -> vector<16x128xf32>
    %82 = arith.addf %80, %81 : vector<16x128xf32>
    %83 = vector.extract_strided_slice %82 {offsets = [0, 0], sizes = [16, 96], strides = [1, 1]} : vector<16x128xf32> to vector<16x96xf32>
    %cst_37 = arith.constant 5.000000e-01 : f32
    %84 = vector.broadcast %cst_37 : f32 to vector<16x96xf32>
    %85 = arith.mulf %84, %83 : vector<16x96xf32>
    %86 = math.tanh %85 : vector<16x96xf32>
    %cst_38 = arith.constant 1.000000e+00 : f32
    %87 = vector.broadcast %cst_38 : f32 to vector<16x96xf32>
    %88 = arith.addf %86, %87 : vector<16x96xf32>
    %cst_39 = arith.constant 5.000000e-01 : f32
    %89 = vector.broadcast %cst_39 : f32 to vector<16x96xf32>
    %90 = arith.mulf %89, %88 : vector<16x96xf32>
    %91 = vector.extract_strided_slice %82 {offsets = [0, 96], sizes = [16, 32], strides = [1, 1]} : vector<16x128xf32> to vector<16x32xf32>
    %92 = math.tanh %91 : vector<16x32xf32>
    %93 = vector.extract_strided_slice %90 {offsets = [0, 0], sizes = [16, 32], strides = [1, 1]} : vector<16x96xf32> to vector<16x32xf32>
    %94 = vector.extract_strided_slice %90 {offsets = [0, 32], sizes = [16, 32], strides = [1, 1]} : vector<16x96xf32> to vector<16x32xf32>
    %95 = vector.extract_strided_slice %90 {offsets = [0, 64], sizes = [16, 32], strides = [1, 1]} : vector<16x96xf32> to vector<16x32xf32>
    %96 = arith.mulf %94, %64 : vector<16x32xf32>
    %97 = arith.mulf %93, %92 : vector<16x32xf32>
    %98 = arith.addf %96, %97 : vector<16x32xf32>
    %99 = math.tanh %98 : vector<16x32xf32>
    %100 = arith.mulf %95, %99 : vector<16x32xf32>
    %101 = vector.extract_strided_slice %100 {offsets = [0, 0], sizes = [8, 32], strides = [1, 1]} : vector<16x32xf32> to vector<8x32xf32>
    %c2_40 = arith.constant 2 : index
    %c0_41 = arith.constant 0 : index
    %c0_42 = arith.constant 0 : index
    %102 = vector.load %arg4[%c2_40, %c0_41, %c0_42] : memref<4x8x32xf32, #tpu.memory_space<vmem>>, vector<1x8x32xf32>
    %103 = vector.shape_cast %102 : vector<1x8x32xf32> to vector<8x32xf32>
    %104 = vector.shape_cast %101 : vector<8x32xf32> to vector<1x8x32xf32>
    tpu.vector_store %arg4[%c2_40, %c0_41, %c0_42], %104 {strides = array<i32>} : memref<4x8x32xf32, #tpu.memory_space<vmem>>, vector<1x8x32xf32>,
    %105 = vector.extract_strided_slice %100 {offsets = [8, 0], sizes = [8, 32], strides = [1, 1]} : vector<16x32xf32> to vector<8x32xf32>
    %c1_43 = arith.constant 1 : index
    %c0_44 = arith.constant 0 : index
    %c0_45 = arith.constant 0 : index
    %106 = vector.load %arg5[%c1_43, %c0_44, %c0_45] : memref<4x8x32xf32, #tpu.memory_space<vmem>>, vector<1x8x32xf32>
    %107 = vector.shape_cast %106 : vector<1x8x32xf32> to vector<8x32xf32>
    %108 = vector.shape_cast %105 : vector<8x32xf32> to vector<1x8x32xf32>
    tpu.vector_store %arg5[%c1_43, %c0_44, %c0_45], %108 {strides = array<i32>} : memref<4x8x32xf32, #tpu.memory_space<vmem>>, vector<1x8x32xf32>,
    %109 = vector.extract_strided_slice %100 {offsets = [0, 0], sizes = [8, 32], strides = [1, 1]} : vector<16x32xf32> to vector<8x32xf32>
    %cst_46 = arith.constant dense<0.000000e+00> : vector<8x128xf32>
    %110 = tpu.matmul %109, %3, %cst_46 {dimension_numbers = #tpu.dot_dimension_numbers<[1], [0], [0], [1], [0, 0, 1, 1], [], []>} : vector<8x32xf32>, vector<32x128xf32>, vector<8x128xf32> -> vector<8x128xf32>
    %111 = vector.extract_strided_slice %100 {offsets = [8, 0], sizes = [8, 32], strides = [1, 1]} : vector<16x32xf32> to vector<8x32xf32>
    %cst_47 = arith.constant dense<0.000000e+00> : vector<8x128xf32>
    %112 = tpu.matmul %111, %4, %cst_47 {dimension_numbers = #tpu.dot_dimension_numbers<[1], [0], [0], [1], [0, 0, 1, 1], [], []>} : vector<8x32xf32>, vector<32x128xf32>, vector<8x128xf32> -> vector<8x128xf32>
    %c3_48 = arith.constant 3 : index
    %c0_49 = arith.constant 0 : index
    %c0_50 = arith.constant 0 : index
    %113 = vector.load %arg1[%c3_48, %c0_49, %c0_50] : memref<4x16x128xf32, #tpu.memory_space<vmem>>, vector<1x16x128xf32>
    %114 = vector.shape_cast %113 : vector<1x16x128xf32> to vector<16x128xf32>
    %115 = tpu.concatenate %110, %112 in 0 : vector<8x128xf32>, vector<8x128xf32> -> vector<16x128xf32>
    %116 = arith.addf %114, %115 : vector<16x128xf32>
    %117 = vector.extract_strided_slice %116 {offsets = [0, 0], sizes = [16, 96], strides = [1, 1]} : vector<16x128xf32> to vector<16x96xf32>
    %cst_51 = arith.constant 5.000000e-01 : f32
    %118 = vector.broadcast %cst_51 : f32 to vector<16x96xf32>
    %119 = arith.mulf %118, %117 : vector<16x96xf32>
    %120 = math.tanh %119 : vector<16x96xf32>
    %cst_52 = arith.constant 1.000000e+00 : f32
    %121 = vector.broadcast %cst_52 : f32 to vector<16x96xf32>
    %122 = arith.addf %120, %121 : vector<16x96xf32>
    %cst_53 = arith.constant 5.000000e-01 : f32
    %123 = vector.broadcast %cst_53 : f32 to vector<16x96xf32>
    %124 = arith.mulf %123, %122 : vector<16x96xf32>
    %125 = vector.extract_strided_slice %116 {offsets = [0, 96], sizes = [16, 32], strides = [1, 1]} : vector<16x128xf32> to vector<16x32xf32>
    %126 = math.tanh %125 : vector<16x32xf32>
    %127 = vector.extract_strided_slice %124 {offsets = [0, 0], sizes = [16, 32], strides = [1, 1]} : vector<16x96xf32> to vector<16x32xf32>
    %128 = vector.extract_strided_slice %124 {offsets = [0, 32], sizes = [16, 32], strides = [1, 1]} : vector<16x96xf32> to vector<16x32xf32>
    %129 = vector.extract_strided_slice %124 {offsets = [0, 64], sizes = [16, 32], strides = [1, 1]} : vector<16x96xf32> to vector<16x32xf32>
    %130 = arith.mulf %128, %98 : vector<16x32xf32>
    %131 = arith.mulf %127, %126 : vector<16x32xf32>
    %132 = arith.addf %130, %131 : vector<16x32xf32>
    %133 = math.tanh %132 : vector<16x32xf32>
    %134 = arith.mulf %129, %133 : vector<16x32xf32>
    %135 = vector.extract_strided_slice %134 {offsets = [0, 0], sizes = [8, 32], strides = [1, 1]} : vector<16x32xf32> to vector<8x32xf32>
    %c3_54 = arith.constant 3 : index
    %c0_55 = arith.constant 0 : index
    %c0_56 = arith.constant 0 : index
    %136 = vector.load %arg4[%c3_54, %c0_55, %c0_56] : memref<4x8x32xf32, #tpu.memory_space<vmem>>, vector<1x8x32xf32>
    %137 = vector.shape_cast %136 : vector<1x8x32xf32> to vector<8x32xf32>
    %138 = vector.shape_cast %135 : vector<8x32xf32> to vector<1x8x32xf32>
    tpu.vector_store %arg4[%c3_54, %c0_55, %c0_56], %138 {strides = array<i32>} : memref<4x8x32xf32, #tpu.memory_space<vmem>>, vector<1x8x32xf32>,
    %139 = vector.extract_strided_slice %134 {offsets = [8, 0], sizes = [8, 32], strides = [1, 1]} : vector<16x32xf32> to vector<8x32xf32>
    %c0_57 = arith.constant 0 : index
    %c0_58 = arith.constant 0 : index
    %c0_59 = arith.constant 0 : index
    %140 = vector.load %arg5[%c0_57, %c0_58, %c0_59] : memref<4x8x32xf32, #tpu.memory_space<vmem>>, vector<1x8x32xf32>
    %141 = vector.shape_cast %140 : vector<1x8x32xf32> to vector<8x32xf32>
    %142 = vector.shape_cast %139 : vector<8x32xf32> to vector<1x8x32xf32>
    tpu.vector_store %arg5[%c0_57, %c0_58, %c0_59], %142 {strides = array<i32>} : memref<4x8x32xf32, #tpu.memory_space<vmem>>, vector<1x8x32xf32>,
    %c0_60 = arith.constant 0 : index
    %c0_61 = arith.constant 0 : index
    %143 = vector.load %arg6[%c0_60, %c0_61] : memref<16x32xf32, #tpu.memory_space<vmem>>, vector<16x32xf32>
    tpu.vector_store %arg6[%c0_60, %c0_61], %134 {strides = array<i32>} : memref<16x32xf32, #tpu.memory_space<vmem>>, vector<16x32xf32>,
    %c0_62 = arith.constant 0 : index
    %c0_63 = arith.constant 0 : index
    %144 = vector.load %arg7[%c0_62, %c0_63] : memref<16x32xf32, #tpu.memory_space<vmem>>, vector<16x32xf32>
    tpu.vector_store %arg7[%c0_62, %c0_63], %132 {strides = array<i32>} : memref<16x32xf32, #tpu.memory_space<vmem>>, vector<16x32xf32>,
    return
  }
  func.func @transform_0(%arg0: i32) -> (i32, i32, i32) {
    %c0_i32 = arith.constant 0 : i32
    %c0_i32_0 = arith.constant 0 : i32
    %c0_i32_1 = arith.constant 0 : i32
    return %arg0, %c0_i32, %c0_i32_0 : i32, i32, i32
  }
  func.func @transform_1(%arg0: i32) -> (i32, i32) {
    %c0_i32 = arith.constant 0 : i32
    %c0_i32_0 = arith.constant 0 : i32
    %c0_i32_1 = arith.constant 0 : i32
    return %c0_i32, %c0_i32_0 : i32, i32
  }
  func.func @transform_2(%arg0: i32) -> (i32, i32) {
    %c0_i32 = arith.constant 0 : i32
    %c0_i32_0 = arith.constant 0 : i32
    %c0_i32_1 = arith.constant 0 : i32
    return %c0_i32, %c0_i32_0 : i32, i32
  }
  func.func @transform_3(%arg0: i32) -> (i32, i32, i32) {
    %c0_i32 = arith.constant 0 : i32
    %c0_i32_0 = arith.constant 0 : i32
    %c0_i32_1 = arith.constant 0 : i32
    return %arg0, %c0_i32, %c0_i32_0 : i32, i32, i32
  }
  func.func @transform_4(%arg0: i32) -> (i32, i32, i32) {
    %c1_i32 = arith.constant 1 : i32
    %0 = arith.subi %c1_i32, %arg0 : i32
    %c0_i32 = arith.constant 0 : i32
    %c0_i32_0 = arith.constant 0 : i32
    %c0_i32_1 = arith.constant 0 : i32
    return %0, %c0_i32, %c0_i32_0 : i32, i32, i32
  }
  func.func @transform_5(%arg0: i32) -> (i32, i32) {
    %c0_i32 = arith.constant 0 : i32
    %c0_i32_0 = arith.constant 0 : i32
    %c0_i32_1 = arith.constant 0 : i32
    return %c0_i32, %c0_i32_0 : i32, i32
  }
  func.func @transform_6(%arg0: i32) -> (i32, i32) {
    %c0_i32 = arith.constant 0 : i32
    %c0_i32_0 = arith.constant 0 : i32
    %c0_i32_1 = arith.constant 0 : i32
    return %c0_i32, %c0_i32_0 : i32, i32
  }
}

</mosaic_0001>

<bundles_post_ra>
// kernel: bidirectional_lstm_forward.1
= control target key start
LH: loop header
LB: loop body
LE: loop exit
PB: predicated region body
PF: predicated region fallthrough
CT: control target
= control target key end

     0   :  { %s2656_s0 = inlined_call_operand.hbm [shape: f32[8,16,128], index: 0, kind: input, shape index: {}]   ;;  %s2657_s1 = inlined_call_operand.hbm [shape: f32[32,128], index: 1, kind: input, shape index: {}]   ;;  %s2658_s2 = inlined_call_operand.hbm [shape: f32[32,128], index: 2, kind: input, shape index: {}]   ;;  %s2659_s3 = inlined_call_operand.hbm [shape: f32[8,8,32], index: 3, kind: output, shape index: {0}]   ;;  %s2660_s4 = inlined_call_operand.hbm [shape: f32[8,8,32], index: 4, kind: output, shape index: {1}]   ;;  %s2661_s5 = inlined_call_operand.hbm [shape: f32[16,32], index: 5, kind: output, shape index: {2}]   ;;  %s2662_s6 = inlined_call_operand.hbm [shape: f32[16,32], index: 6, kind: output, shape index: {3}]  }
   0x1   :  { %2673 = sst [smem:[#allocation24_spill]] %s2656_s0 }
   0x2   :  { %12 = vsyncpa [#allocation3], 0 }
   0x3   :  { %14 = vsyncpa [#allocation3 + $0x1], 0 }
   0x4   :  { %15 = vsyncpa [#allocation6], 0 }
   0x5   :  { %16 = vsyncpa [#allocation4], 0 }
   0x6   :  { %18 = vsyncpa [#allocation4 + $0x1], 0 }
   0x7   :  { %19 = vsyncpa [#allocation10], 0 }
   0x8   :  { %21 = vsyncpa [#allocation10 + $0x1], 0 }
   0x9   :  { %22 = vsyncpa [#allocation13], 0  ;;  %s2104_s21 = smov 0   ;;  %s2106_s22 = smov 0  }
   0xa   :  { %s2108_s23 = smov 0   ;;  %s2110_s24 = smov 0  }
   0xb   :  { %s2112_s25 = smov 0   ;;  %s2114_s26 = smov 0  }
   0xc   :  { %s2116_s27 = smov 0  }
   0xd LB: > { %2674 = sst [smem:[#allocation20_spill]] %s2033_s23  ;;  %s2138_s28 = sadd.s32 4294967295, %s2049_s27   ;;  %s2049_s27 = sphi %s2116_s27, %s2721_s27   ;;  %s2045_s26 = sphi %s2114_s26, %s2720_s26   ;;  %s2041_s25 = sphi %s2112_s25, %s2719_s25   ;;  %s2037_s24 = sphi %s2110_s24, %s2718_s24   ;;  %s2033_s23 = sphi %s2108_s23, %s2715_s23   ;;  %s2029_s22 = sphi %s2106_s22, %s2717_s22   ;;  %s2025_s21 = sphi %s2104_s21, %s2716_s21  }
   0xe   : > { %s2663_s29 = sadd.s32 4294967294, %s2049_s27   ;;  %s2142_s30 = sadd.s32 1, %s2049_s27  }
   0xf   : > { %p48_p0 = scmp.ne.s32.totalorder %s2041_s25, %s2037_s24  ;;  %p2664_p1 = scmp.eq.s32.totalorder %s2138_s28, 0 }
  0x10   : > { %p2665_p2 = scmp.eq.s32.totalorder %s2138_s28, 1  ;;  %p120_p3 = scmp.eq.s32.totalorder %s2663_s29, 1 }
  0x11   : > { %s126_s7 = ssub.s32 1, %s2049_s27  ;;  %p2153_p4 = por %p2664_p1, %p48_p0 }
  0x12   : > { %s127_s9 = ssub.s32 1, %s2142_s30  ;;  %p2158_p5 = por %p120_p3, %p48_p0 }
  0x13   : > { %s2675_s8 = scalar_select %p2153_p4, 1, 0 }
  0x14   : > { %s2676_s10 = scalar_select %p2158_p5, 1, 0 }
  0x15   : > { %s128_s11 = ssub.s32 %s126_s7, %s127_s9  ;;  %s131_s12 = sadd.s32 1, %s2033_s23 }
  0x16   : > { %2677 = sst [smem:[#allocation21_spill]] %s2676_s10  ;;  %p129_p6 = scmp.eq.s32.totalorder %s128_s11, 0 }
  0x17   : > { %p141_p7 = scmp.ne.s32.totalorder %s2033_s23, %s2029_s22  ;;  %p147_p8 = scmp.ne.s32.totalorder %s2029_s22, %s2025_s21 }
  0x18   : > { %s2167_s13 = scalar_select %p129_p6, %s2033_s23, %s131_s12  }
  0x19   : > { %p2171_p9 = por %p141_p7, %p2665_p2  ;;  %p2175_p10 = por %p147_p8, %p120_p3 }
  0x1a   : > { %2678 = sst [smem:[#allocation22_spill]] %s2167_s13  ;;  %p1381_p11 = scmp.ge.s32.totalorder %s2049_s27, 1 }
  0x1b   : > { %s2679_s14 = scalar_select %p2171_p9, 1, 0 }
  0x1c   : > { %s2680_s15 = scalar_select %p2175_p10, 1, 0 }
  0x1d   : > { %p197_p12 = scmp.lt.s32.totalorder %s2049_s27, 3  ;;  %s2051_s17 = smov [#allocation5]  }
  0x1e   : > { %2681 = sst [smem:[#allocation23_spill]] %s2680_s15  ;;  %s209_s18 = sshll.u32 %s2051_s17, 4  ;;  %s2186_s18 = int_to_ptr.vmem [resolvable:$true] %s209_s18 }
  0x1f   : > { %p2182_p0 = pnand %p1381_p11, %p197_p12  ;;  %s2052_s20 = smov [#allocation7]  }
  0x20   : > { %s222_s21 = sshll.u32 %s2052_s20, 4  ;;  %s1777_s11 = scalar_lea.hbm %s2657_s1, 512  ;;  %s2197_s21 = int_to_ptr.vmem [resolvable:$true] %s222_s21 }
  0x21   : > { %p1630_p6 = pneg %p2182_p0  ;;  %p1778_p8 = scmp.ne.s32.totalorder %s2657_s1, %s1777_s11 }
  0x22   : > { %p1784_p7 = scmp.lt.u32.totalorder %s1777_s11, %s2657_s1 }
  0x23   : > { %p2193_p3 = pnand %p1630_p6, %p2664_p1 }
  0x25   : > { %p1779_p11 = pneg %p2193_p3 }
  0x27   : > { %p1780_p12 = pnand %p1779_p11, %p1778_p8 }
  0x29   : > { %p1781_p6 = pneg %p1780_p12 }
  0x2b   : > { %p1786_p13 = pnand %p1784_p7, %p1781_p6 }
  0x2d   : > { %1789 = shalt.err (!%p1786_p13)
}
  0x2e   : > { %s1790_s20 = scalar_lea.vmem %s2186_s18, 512  ;;  %p1798_p5 = scmp.lt.s32.totalorder %s2186_s18, %s2186_s18 }
  0x2f   : > { %p1791_p1 = scmp.ne.s32.totalorder %s2186_s18, %s1790_s20  ;;  %p1799_p8 = scmp.lt.s32.totalorder %s1790_s20, %s1790_s20 }
  0x31   : > { %p1793_p2 = pnand %p1791_p1, %p1779_p11  ;;  %p1800_p12 = por %p1799_p8, %p1798_p5 }
  0x33   : > { %p1794_p10 = pneg %p1793_p2 }
  0x35   : > { %p1801_p9 = pnand %p1800_p12, %p1794_p10 }
  0x37   : > { %1804 = shalt.err (!%p1801_p9)
}
  0x38   : > { %s2670_s29 = smov 128   ;;  %s2054_s13 = smov 8  }
  0x39   : > { %1633 = dma.hbm_to_vmem [thread:$0]  (!%p2193_p3), %s2657_s1, 512, %s2186_s18, [#allocation6], %s2670_s29, %s2670_s29, %s2054_s13  }
  0x3a   : > { %s1805_s17 = scalar_lea.hbm %s2658_s2, 512 }
  0x3b   : > { %p1806_p1 = scmp.ne.s32.totalorder %s2658_s2, %s1805_s17  ;;  %p1812_p9 = scmp.lt.u32.totalorder %s1805_s17, %s2658_s2 }
  0x3d   : > { %p1808_p2 = pnand %p1806_p1, %p1779_p11 }
  0x3f   : > { %p1809_p5 = pneg %p1808_p2 }
  0x41   : > { %p1814_p10 = pnand %p1812_p9, %p1809_p5 }
  0x43   : > { %1817 = shalt.err (!%p1814_p10)
}
  0x44   : > { %s1818_s18 = scalar_lea.vmem %s2197_s21, 512  ;;  %p1826_p8 = scmp.lt.s32.totalorder %s2197_s21, %s2197_s21 }
  0x45   : > { %p1819_p13 = scmp.ne.s32.totalorder %s2197_s21, %s1818_s18  ;;  %p1827_p12 = scmp.lt.s32.totalorder %s1818_s18, %s1818_s18 }
  0x47   : > { %p1821_p7 = pnand %p1819_p13, %p1779_p11  ;;  %p1828_p1 = por %p1827_p12, %p1826_p8 }
  0x49   : > { %p1822_p6 = pneg %p1821_p7 }
  0x4b   : > { %p1829_p2 = pnand %p1828_p1, %p1822_p6 }
  0x4d   : > { %1832 = shalt.err (!%p1829_p2)
}
  0x4e   : > { %1636 = dma.hbm_to_vmem [thread:$0]  (!%p2193_p3), %s2658_s2, 512, %s2197_s21, [#allocation6], %s2670_s29, %s2670_s29, %s2054_s13  }
  0x4f   : > { %s32_s15 = ssub.s32 %s2049_s27, %s2142_s30  ;;  %s35_s19 = sadd.s32 1, %s2045_s26 }
  0x50   : > { %p33_p11 = scmp.eq.s32.totalorder %s32_s15, 0  ;;  %p42_p5 = scmp.ne.s32.totalorder %s2045_s26, %s2041_s25 }
  0x51   : > { %p43_p9 = scmp.eq.s32.totalorder %s2049_s27, 0  ;;  %p1650_p10 = scmp.lt.s32.totalorder %s2049_s27, 2 }
  0x52   : > { %s2265_s7 = scalar_select %p33_p11, %s2045_s26, %s35_s19  }
  0x53   : > { %p44_p13 = por %p43_p9, %p42_p5  ;;  %p2684_p7 = scmp.eq.s32.totalorder %s2138_s28, 1 }
  0x54   : > { %s236_s11 = sand.u32 1, %s2045_s26   ;;  %s1429_s12 = sshll.u32 %s2049_s27, 10 }
  0x55   : > { %p2269_p6 = por %p2684_p7, %p42_p5  ;;  %s1385_s17 = sshll.u32 %s236_s11, 6 }
  0x56   : > { %s2686_s0 = sld [smem:[#allocation24_spill]]  ;;  %s240_s23 = scalar_lea.vmem [#allocation2], %s1385_s17 }
  0x57   : > { %s2685_s9 = scalar_select %p2269_p6, 1, 0 }
  0x58   : > { %s248_s10 = sshll.u32 %s240_s23, 4  ;;  %p2280_p3 = pnand %p1650_p10, %p44_p13  ;;  %s2284_s10 = int_to_ptr.vmem [resolvable:$true] %s248_s10 }
  0x59   : > { %s2286_s19 = scalar_lea.sflag [#allocation3], %s236_s11 }
  0x5a   : > { %p1835_p12 = pneg %p2280_p3 }
  0x5c   : > { %s2278_s21 = scalar_lea.hbm %s2686_s0, %s1429_s12  ;;  %s1838_s20 = scalar_lea.hbm %s2686_s0, 2048 }
  0x5d   : > { %s1833_s29 = scalar_lea.hbm %s2278_s21, 1024  ;;  %p1839_p11 = scmp.lt.u32.totalorder %s2278_s21, %s2686_s0 }
  0x5e   : > { %p1834_p8 = scmp.ne.s32.totalorder %s2278_s21, %s1833_s29  ;;  %p1840_p5 = scmp.lt.u32.totalorder %s1838_s20, %s1833_s29 }
  0x5f   : > { %p1842_p10 = scmp.lt.u32.totalorder %s1833_s29, %s2278_s21 }
  0x60   : > { %p1836_p1 = pnand %p1835_p12, %p1834_p8  ;;  %p1841_p9 = por %p1840_p5, %p1839_p11 }
  0x62   : > { %p1837_p2 = pneg %p1836_p1  ;;  %p1843_p13 = por %p1842_p10, %p1841_p9 }
  0x64   : > { %p1844_p7 = pnand %p1843_p13, %p1837_p2 }
  0x66   : > { %1847 = shalt.err (!%p1844_p7)
}
  0x67   : > { %s1848_s11 = scalar_lea.vmem %s2284_s10, 1024  ;;  %s2055_s12 = smov [#allocation2]  }
  0x68   : > { %p1849_p8 = scmp.ne.s32.totalorder %s2284_s10, %s1848_s11  ;;  %s1853_s17 = sshll.u32 %s2055_s12, 4  ;;  %s1854_s17 = int_to_ptr.vmem [resolvable:$false] %s1853_s17 }
  0x69   : > { %s1855_s18 = scalar_lea.vmem %s1854_s17, 2048  ;;  %p1856_p4 = scmp.lt.s32.totalorder %s2284_s10, %s1854_s17 }
  0x6a   : > { %p1851_p1 = pnand %p1849_p8, %p1835_p12  ;;  %p1857_p11 = scmp.lt.s32.totalorder %s1855_s18, %s1848_s11 }
  0x6c   : > { %p1852_p6 = pneg %p1851_p1  ;;  %p1858_p5 = por %p1857_p11, %p1856_p4 }
  0x6e   : > { %p1859_p9 = pnand %p1858_p5, %p1852_p6 }
  0x70   : > { %1862 = shalt.err (!%p1859_p9)
}
  0x71   : > { %s2688_s29 = smov 128   ;;  %260 = sbr.rel (%p2182_p0) target bundleno = 3044 (0xbe4), region = 32 }
  0x72   : > { %1640 = dma.hbm_to_vmem [thread:$0]  (!%p2280_p3), %s2278_s21, 1024, %s2284_s10, %s2286_s19, %s2688_s29, %s2688_s29, %s2054_s13  }
  0x73   : > { %s2320_s20 = sand.u32 (!%p2182_p0), 1, %s2041_s25   ;;  %p2689_p4 = scmp.ne.s32.totalorder (!%p2182_p0), %s2675_s8, 0 }
  0x74   : > { %s1390_s23 = sshll.u32 (!%p2182_p0), %s2320_s20, 6  ;;  %s263_s11 = scalar_lea.sflag (!%p2182_p0), [#allocation3], %s2320_s20 }
  0x75   : > { %s2324_s12 = scalar_lea.vmem (!%p2182_p0), [#allocation2], %s1390_s23 }
  0x78   : > { %2000 = dma.done.wait (%p2689_p4), %s263_s11, 1024  }
  0x79   : > { %2002 = vsyncadd (%p2689_p4), %s263_s11, 4294966272  ;;  %p2690_p6 = scmp.eq.s32.totalorder %s2138_s28, 0 }
  0x7b   : > { %2004 = dma.done.wait (%p2690_p6), [#allocation6], 1024   ;;  %p2691_p0 = pmov %p2690_p6 }
  0x7c   : > { %s1393_s16 = sshll.u32 %s2320_s20, 5  ;;  %s301_s13 = sand.u32 1, %s2029_s22  }
  0x7d   : > { %2006 = vsyncadd (%p2691_p0), [#allocation6], 4294966272  ;;  %s1394_s21 = sshll.u32 %s301_s13, 5  ;;  %s2336_s10 = scalar_lea.vmem [#allocation8], %s1393_s16 }
  0x7e   : > { %s2338_s15 = scalar_lea.vmem [#allocation9], %s1394_s21  ;;  %p2692_p3 = scmp.ne.s32.totalorder %s2138_s28, 0 }
  0x7f   : > { %vm316_vm0 = vcmask (!%p2692_p3), 261120   ;;  %v2056_v0 = vmov (!%p2692_p3), 0.0  }
  0x80   : > { %315 = sbr.rel (%p2692_p3) target bundleno = 135 (0x87), region = 48  ;;  %317 = vst.msk [vmem:[#allocation11] sm:$0xff] (!%p2692_p3), %vm316_vm0, %v2056_v0  ;;  %318 = vst.msk [vmem:[#allocation11 + $0x8] sm:$0xff] (!%p2692_p3), %vm316_vm0, %v2056_v0 }
  0x81   : > { %319 = vst.msk [vmem:[#allocation12] sm:$0xff] (!%p2692_p3), %vm316_vm0, %v2056_v0  ;;  %320 = vst.msk [vmem:[#allocation12 + $0x8] sm:$0xff] (!%p2692_p3), %vm316_vm0, %v2056_v0 }
  0x87 PF: > { %v325_v1 = vld [vmem:[#allocation7] sm:$0xff]  ;;  %v326_v2 = vld [vmem:[#allocation7 + $0x8] sm:$0xff]  ;;  %v2057_v4 = vmov 0.0|0.0   ;;  %v327_v7 = vld [vmem:[#allocation7 + $0x10] sm:$0xff]  ;;  %vm2058_vm1 = vmmov 0   ;;  %v2059_v10 = vmov 0.0  }
  0x88   : > { %v321_v3 = vld [vmem:[#allocation5] sm:$0xff]  ;;  %1566 = vmatprep.subr.bf16.mxu1 %v2057_v4  ;;  %v2343_v5 = vpack.c.bf16 %v326_v2, %v325_v1  ;;  %1560 = vmatprep.subr.bf16.mxu0 %v2057_v4  ;;  %v322_v6 = vld [vmem:[#allocation5 + $0x8] sm:$0xff]  ;;  %v328_v8 = vld [vmem:[#allocation7 + $0x18] sm:$0xff]  ;;  %s2060_s8 = smov 32   ;;  %vm333_vm2 = vcmask 261120   ;;  %s2061_s19 = smov 64  }
  0x89   : > { %v2346_v9 = vpack.c.bf16 %v322_v6, %v321_v3  ;;  %1491 = vmatprep.mubr.msk.f32.mxu1 %vm2058_vm1, %v2059_v10  ;;  %v323_v11 = vld [vmem:[#allocation5 + $0x10] sm:$0xff]  ;;  %v324_v12 = vld [vmem:[#allocation5 + $0x18] sm:$0xff]  ;;  %1480 = vmatprep.mubr.msk.f32.mxu0 %vm2058_vm1, %v2059_v10  ;;  %v2353_v13 = vpack.c.bf16 %v328_v8, %v327_v7  ;;  %v330_v17 = vld [vmem:[#allocation11 + $0x8] sm:$0xff]  ;;  %s2062_s17 = smov 96   ;;  %s1202_s18 = ssub.s32 1, %s2138_s28 }
  0x8a   : > { %1568 = vmatpush3.bf16.msra.mxu1 %v2343_v5  ;;  %v332_v14 = vld [vmem:[#allocation12 + $0x8] sm:$0xff]  ;;  %v2357_v15 = vpack.c.bf16 %v324_v12, %v323_v11  ;;  %v331_v16 = vld [vmem:[#allocation12] sm:$0xff]  ;;  %v329_v18 = vld [vmem:[#allocation11] sm:$0xff]  ;;  %s1178_s29 = sand.u32 1, %s2138_s28   ;;  %s1431_s23 = sshll.u32 %s1202_s18, 9 }
  0x8b   : > { %1562 = vmatpush3.bf16.msra.mxu0 %v2346_v9  ;;  %1569 = vmatprep.subr.bf16.mxu1 %v2057_v4  ;;  %v481_v19 = vld [vmem:[%s2324_s12 + $0x8] sm:$0xff]  ;;  %v480_v20 = vld [vmem:[%s2324_s12] sm:$0xff]  ;;  %v1402_v57 = vld [vmem:[%s2324_s12 + $0x18] sm:$0xff]  ;;  %s1209_s11 = sshll.u32 %s2338_s15, 4  ;;  %s2474_s13 = scalar_lea.hbm %s2660_s4, %s1431_s23  ;;  %s2476_s11 = int_to_ptr.vmem [resolvable:$true] %s1209_s11 }
  0x8c   : > { %1563 = vmatprep.subr.bf16.mxu0 %v2057_v4  ;;  %498 = vrot.lane.b32.xlu1 %v332_v14, %s2060_s8  ;;  %v1401_v61 = vld [vmem:[%s2324_s12 + $0x10] sm:$0xff]  ;;  %s2064_s18 = smov [#allocation12]   ;;  %s2487_s23 = scalar_lea.sflag [#allocation10], %s1178_s29 }
  0x8d   : > { %s2485_s0 = sshll.u32 %s2064_s18, 4  ;;  %p2693_p2 = scmp.ne.s32.totalorder %s2679_s14, 0  ;;  %s2533_s0 = int_to_ptr.vmem [resolvable:$true] %s2485_s0 }
  0x8e   : > { %1571 = vmatpush3.bf16.msra.mxu1 %v2353_v13  ;;  %s2065_s16 = smov [#allocation9]  }
  0x8f   : > { %1565 = vmatpush3.bf16.msra.mxu0 %v2357_v15  ;;  %1578 = vmatprep.subr.bf16.mxu1 %v2057_v4 }
  0x90   : > { %496 = vrot.lane.b32.xlu1 %v331_v16, %s2060_s8  ;;  %1572 = vmatprep.subr.bf16.mxu0 %v2057_v4 }
  0x91   : > { %1492 = vmatmul.mubr.msk.f32.vlgmr.msra.gmra.mrb[0].mxu1 %vm333_vm2, %v330_v17 }
  0x92   : > { %1481 = vmatmul.mubr.msk.f32.vlgmr.msra.gmra.mrb[0].mxu0 %vm333_vm2, %v329_v18  ;;  %1580 = vmatpush3.bf16.msra.mxu1 %v2343_v5 }
  0x93   : > { %1581 = vmatprep.subr.bf16.mxu1 %v2057_v4  ;;  %1574 = vmatpush3.bf16.msra.mxu0 %v2346_v9 }
  0x94   : > { %1513 = vmatprep.mubr.msk.f32.mxu1 %vm2058_vm1, %v2059_v10  ;;  %1575 = vmatprep.subr.bf16.mxu0 %v2057_v4 }
  0x95   : > { %1502 = vmatprep.mubr.msk.f32.mxu0 %vm2058_vm1, %v2059_v10 }
  0x96   : > { %1583 = vmatpush3.bf16.msra.mxu1 %v2353_v13 }
  0x97   : > { %1577 = vmatpush3.bf16.msra.mxu0 %v2357_v15  ;;  %1590 = vmatprep.subr.bf16.mxu1 %v2057_v4 }
  0x98   : > { %1584 = vmatprep.subr.bf16.mxu0 %v2057_v4 }
  0xfe   : > { %v499_v41 = vpop.permute.xlu1 %498 }
 0x102   : > { %v497_v43 = vpop.permute.xlu1 %496 }
 0x164   : > { %v476_v21 = vpop.f32.mrb[0].mxu1 }
 0x165   : > { %v483_v22 = vadd.f32 %v481_v19, %v476_v21  ;;  %v1493_v23 = vpop.f32.mrb[1].mxu1  ;;  %v403_v24 = vpop.f32.mrb[0].mxu0 }
 0x166   : > { %v482_v25 = vadd.f32 %v480_v20, %v403_v24  ;;  %v1482_v26 = vpop.f32.mrb[1].mxu0 }
 0x167   : > { %1729 = vtanh.f32 %v483_v22  ;;  %v485_v29 = vmul.f32 0.5, %v483_v22 }
 0x168   : > { %1731 = vtanh.f32 %v482_v25  ;;  %v484_v30 = vmul.f32 0.5, %v482_v25 }
 0x169   : > { %1733 = vtanh.f32 %v485_v29 }
 0x16a   : > { %1735 = vtanh.f32 %v484_v30 }
 0x171   : > { %v1730_v27 = vpop.eup %1729 }
 0x172   : > { %508 = vrot.lane.b32.xlu0 %v1730_v27, %s2060_s8  ;;  %v1732_v28 = vpop.eup %1731 }
 0x173   : > { %v1734_v31 = vpop.eup %1733 }
 0x174   : > { %v489_v32 = vadd.f32 1.0, %v1734_v31  ;;  %v1736_v33 = vpop.eup %1735 }
 0x175   : > { %v488_v35 = vadd.f32 1.0, %v1736_v33 }
 0x176   : > { %506 = vrot.lane.b32.xlu0 %v1732_v28, %s2060_s8  ;;  %v491_v34 = vmul.f32 0.5, %v489_v32 }
 0x177   : > { %v490_v38 = vmul.f32 0.5, %v488_v35 }
 0x178   : > { %v503_v42 = vmul.f32 %v499_v41, %v491_v34 }
 0x179   : > { %v502_v46 = vmul.f32 %v497_v43, %v490_v38 }
 0x1e4   : > { %v509_v36 = vpop.permute.xlu0 %508 }
 0x1e5   : > { %v513_v37 = vmul.f32 %v509_v36, %v491_v34 }
 0x1e7   : > { %518 = vrot.lane.b32.xlu0 %v513_v37, %s2060_s8 }
 0x1e8   : > { %v507_v39 = vpop.permute.xlu0 %506 }
 0x1e9   : > { %v512_v40 = vmul.f32 %v507_v39, %v490_v38 }
 0x1eb   : > { %516 = vrot.lane.b32.xlu1 %v512_v40, %s2060_s8 }
 0x259   : > { %v519_v44 = vpop.permute.xlu0 %518 }
 0x25a   : > { %v2386_v45 = vadd.f32 %v519_v44, %v503_v42 }
 0x25c   : > { %1737 = vtanh.f32 %v2386_v45 }
 0x25d   : > { %v517_v47 = vpop.permute.xlu1 %516 }
 0x25e   : > { %v2389_v48 = vadd.f32 %v517_v47, %v502_v46 }
 0x260   : > { %1739 = vtanh.f32 %v2389_v48 }
 0x266   : > { %v1738_v49 = vpop.eup %1737 }
 0x267   : > { %530 = vrot.lane.b32.xlu0 %v1738_v49, %s2060_s8 }
 0x26a   : > { %v1740_v50 = vpop.eup %1739 }
 0x26b   : > { %528 = vrot.lane.b32.xlu1 %v1740_v50, %s2060_s8 }
 0x2d9   : > { %v531_v51 = vpop.permute.xlu0 %530 }
 0x2da   : > { %v535_v52 = vmul.f32 %v531_v51, %v491_v34 }
 0x2dc   : > { %542 = vrot.lane.b32.xlu0 %v535_v52, %s2061_s19 }
 0x2dd   : > { %v529_v53 = vpop.permute.xlu1 %528 }
 0x2de   : > { %v534_v54 = vmul.f32 %v529_v53, %v490_v38  ;;  %v1407_v38 = vld [vmem:[%s2324_s12 + $0x20] sm:$0xff] }
 0x2e0   : > { %537 = vrot.lane.b32.xlu1 %v534_v54, %s2061_s19 }
 0x34e   : > { %v543_v55 = vpop.permute.xlu0 %542 }
 0x34f   : > { %1398 = vst.msk [vmem:[%s2338_s15 + $0x18] sm:$0xff] %vm333_vm2, %v543_v55  ;;  %1514 = vmatmul.mubr.msk.f32.vlgmr.msra.gmra.mrb[2].mxu1 %vm333_vm2, %v543_v55 }
 0x350   : > { %1592 = vmatpush3.bf16.msra.mxu1 %v2343_v5  ;;  %1535 = vmatprep.mubr.msk.f32.mxu1 %vm2058_vm1, %v2059_v10 }
 0x351   : > { %1593 = vmatprep.subr.bf16.mxu1 %v2057_v4 }
 0x352   : > { %v538_v56 = vpop.permute.xlu1 %537 }
 0x353   : > { %540 = vst.msk [vmem:[%s2336_s10] sm:$0xff] %vm333_vm2, %v538_v56  ;;  %1503 = vmatmul.mubr.msk.f32.vlgmr.msra.gmra.mrb[2].mxu0 %vm333_vm2, %v538_v56 }
 0x354   : > { %1586 = vmatpush3.bf16.msra.mxu0 %v2346_v9  ;;  %1595 = vmatpush3.bf16.msra.mxu1 %v2353_v13 }
 0x355   : > { %1587 = vmatprep.subr.bf16.mxu0 %v2057_v4  ;;  %1524 = vmatprep.mubr.msk.f32.mxu0 %vm2058_vm1, %v2059_v10 }
 0x356   : > { %1602 = vmatprep.subr.bf16.mxu1 %v2057_v4 }
 0x358   : > { %1589 = vmatpush3.bf16.msra.mxu0 %v2357_v15 }
 0x359   : > { %1596 = vmatprep.subr.bf16.mxu0 %v2057_v4 }
 0x422   : > { %v687_v58 = vpop.f32.mrb[2].mxu1 }
 0x423   : > { %v695_v59 = vadd.f32 %v1402_v57, %v687_v58  ;;  %v1515_v60 = vpop.f32.mrb[3].mxu1 }
 0x425   : > { %1741 = vtanh.f32 %v695_v59  ;;  %v697_v3 = vmul.f32 0.5, %v695_v59 }
 0x426   : > { %v615_v62 = vpop.f32.mrb[2].mxu0 }
 0x427   : > { %v694_v63 = vadd.f32 %v1401_v61, %v615_v62  ;;  %v1504_v0 = vpop.f32.mrb[3].mxu0 }
 0x429   : > { %1743 = vtanh.f32 %v694_v63  ;;  %v696_v6 = vmul.f32 0.5, %v694_v63 }
 0x42a   : > { %1745 = vtanh.f32 %v697_v3 }
 0x42b   : > { %1747 = vtanh.f32 %v696_v6 }
 0x42f   : > { %v1742_v1 = vpop.eup %1741 }
 0x430   : > { %712 = vrot.lane.b32.xlu0 %v1742_v1, %s2060_s8  ;;  %v1414_v1 = vld [vmem:[%s2324_s12 + $0x38] sm:$0xff] }
 0x433   : > { %v1744_v2 = vpop.eup %1743 }
 0x434   : > { %710 = vrot.lane.b32.xlu1 %v1744_v2, %s2060_s8  ;;  %v1746_v7 = vpop.eup %1745 }
 0x435   : > { %v701_v8 = vadd.f32 1.0, %v1746_v7  ;;  %v1748_v11 = vpop.eup %1747  ;;  %v1413_v7 = vld [vmem:[%s2324_s12 + $0x30] sm:$0xff] }
 0x436   : > { %v700_v14 = vadd.f32 1.0, %v1748_v11 }
 0x437   : > { %v703_v12 = vmul.f32 0.5, %v701_v8 }
 0x438   : > { %v702_v18 = vmul.f32 0.5, %v700_v14 }
 0x439   : > { %v707_v21 = vmul.f32 %v703_v12, %v2386_v45 }
 0x43a   : > { %v706_v24 = vmul.f32 %v702_v18, %v2389_v48 }
 0x4a2   : > { %v713_v16 = vpop.permute.xlu0 %712 }
 0x4a3   : > { %v717_v17 = vmul.f32 %v713_v16, %v703_v12 }
 0x4a5   : > { %722 = vrot.lane.b32.xlu0 %v717_v17, %s2060_s8 }
 0x4a6   : > { %v711_v19 = vpop.permute.xlu1 %710 }
 0x4a7   : > { %v716_v20 = vmul.f32 %v711_v19, %v702_v18 }
 0x4a9   : > { %720 = vrot.lane.b32.xlu1 %v716_v20, %s2060_s8 }
 0x517   : > { %v723_v22 = vpop.permute.xlu0 %722 }
 0x518   : > { %v727_v23 = vadd.f32 %v723_v22, %v707_v21 }
 0x51a   : > { %1749 = vtanh.f32 %v727_v23 }
 0x51b   : > { %v721_v25 = vpop.permute.xlu1 %720 }
 0x51c   : > { %v726_v26 = vadd.f32 %v721_v25, %v706_v24 }
 0x51e   : > { %1751 = vtanh.f32 %v726_v26 }
 0x524   : > { %v1750_v27 = vpop.eup %1749 }
 0x525   : > { %734 = vrot.lane.b32.xlu0 %v1750_v27, %s2060_s8 }
 0x528   : > { %v1752_v28 = vpop.eup %1751 }
 0x529   : > { %732 = vrot.lane.b32.xlu1 %v1752_v28, %s2060_s8 }
 0x597   : > { %v735_v29 = vpop.permute.xlu0 %734 }
 0x598   : > { %v739_v30 = vmul.f32 %v735_v29, %v703_v12 }
 0x59a   : > { %747 = vrot.lane.b32.xlu0 %v739_v30, %s2061_s19 }
 0x59b   : > { %v733_v31 = vpop.permute.xlu1 %732 }
 0x59c   : > { %v738_v32 = vmul.f32 %v733_v31, %v702_v18 }
 0x59e   : > { %741 = vrot.lane.b32.xlu1 %v738_v32, %s2061_s19 }
 0x60c   : > { %v748_v33 = vpop.permute.xlu0 %747 }
 0x60d   : > { %1404 = vst.msk [vmem:[%s2338_s15 + $0x10] sm:$0xff] %vm333_vm2, %v748_v33  ;;  %1536 = vmatmul.mubr.msk.f32.vlgmr.msra.gmra.mrb[4].mxu1 %vm333_vm2, %v748_v33 }
 0x60e   : > { %1604 = vmatpush3.bf16.msra.mxu1 %v2343_v5  ;;  %1557 = vmatprep.mubr.msk.f32.mxu1 %vm2058_vm1, %v2059_v10  ;;  %v1408_v5 = vld [vmem:[%s2324_s12 + $0x28] sm:$0xff]  ;;  %s1863_s12 = scalar_lea.vmem %s2476_s11, 512 }
 0x60f   : > { %1605 = vmatprep.subr.bf16.mxu1 %v2057_v4  ;;  %p1864_p12 = scmp.ne.s32.totalorder %s2476_s11, %s1863_s12 }
 0x610   : > { %v742_v34 = vpop.permute.xlu1 %741 }
 0x611   : > { %1403 = vst.msk [vmem:[%s2336_s10 + $0x8] sm:$0xff] %vm333_vm2, %v742_v34  ;;  %1525 = vmatmul.mubr.msk.f32.vlgmr.msra.gmra.mrb[4].mxu0 %vm333_vm2, %v742_v34  ;;  %p1865_p10 = pnand %p1864_p12, %p2693_p2 }
 0x612   : > { %1598 = vmatpush3.bf16.msra.mxu0 %v2346_v9  ;;  %1607 = vmatpush3.bf16.msra.mxu1 %v2353_v13 }
 0x613   : > { %1599 = vmatprep.subr.bf16.mxu0 %v2057_v4  ;;  %1546 = vmatprep.mubr.msk.f32.mxu0 %vm2058_vm1, %v2059_v10  ;;  %p1866_p13 = pneg %p1865_p10 }
 0x616   : > { %1601 = vmatpush3.bf16.msra.mxu0 %v2357_v15 }
 0x6e0   : > { %v892_v35 = vpop.f32.mrb[4].mxu1 }
 0x6e1   : > { %v900_v36 = vadd.f32 %v1408_v5, %v892_v35  ;;  %v1537_v37 = vpop.f32.mrb[5].mxu1 }
 0x6e3   : > { %1753 = vtanh.f32 %v900_v36  ;;  %v902_v4 = vmul.f32 0.5, %v900_v36 }
 0x6e4   : > { %v820_v39 = vpop.f32.mrb[4].mxu0 }
 0x6e5   : > { %v899_v40 = vadd.f32 %v1407_v38, %v820_v39  ;;  %v1526_v41 = vpop.f32.mrb[5].mxu0 }
 0x6e7   : > { %1755 = vtanh.f32 %v899_v40  ;;  %v901_v10 = vmul.f32 0.5, %v899_v40 }
 0x6e8   : > { %1757 = vtanh.f32 %v902_v4 }
 0x6e9   : > { %1759 = vtanh.f32 %v901_v10 }
 0x6ed   : > { %v1754_v9 = vpop.eup %1753 }
 0x6ee   : > { %917 = vrot.lane.b32.xlu0 %v1754_v9, %s2060_s8 }
 0x6f1   : > { %v1756_v13 = vpop.eup %1755 }
 0x6f2   : > { %915 = vrot.lane.b32.xlu1 %v1756_v13, %s2060_s8  ;;  %v1758_v15 = vpop.eup %1757 }
 0x6f3   : > { %v906_v42 = vadd.f32 1.0, %v1758_v15  ;;  %v1760_v43 = vpop.eup %1759 }
 0x6f4   : > { %v905_v45 = vadd.f32 1.0, %v1760_v43 }
 0x6f5   : > { %v908_v44 = vmul.f32 0.5, %v906_v42 }
 0x6f6   : > { %v907_v48 = vmul.f32 0.5, %v905_v45 }
 0x6f7   : > { %v912_v51 = vmul.f32 %v908_v44, %v727_v23 }
 0x6f8   : > { %v911_v54 = vmul.f32 %v907_v48, %v726_v26 }
 0x760   : > { %v918_v46 = vpop.permute.xlu0 %917 }
 0x761   : > { %v922_v47 = vmul.f32 %v918_v46, %v908_v44 }
 0x763   : > { %927 = vrot.lane.b32.xlu0 %v922_v47, %s2060_s8 }
 0x764   : > { %v916_v49 = vpop.permute.xlu1 %915 }
 0x765   : > { %v921_v50 = vmul.f32 %v916_v49, %v907_v48 }
 0x767   : > { %925 = vrot.lane.b32.xlu1 %v921_v50, %s2060_s8 }
 0x7d5   : > { %v928_v52 = vpop.permute.xlu0 %927 }
 0x7d6   : > { %v932_v53 = vadd.f32 %v928_v52, %v912_v51 }
 0x7d8   : > { %1761 = vtanh.f32 %v932_v53 }
 0x7d9   : > { %v926_v55 = vpop.permute.xlu1 %925 }
 0x7da   : > { %v931_v56 = vadd.f32 %v926_v55, %v911_v54 }
 0x7dc   : > { %1763 = vtanh.f32 %v931_v56 }
 0x7e2   : > { %v1762_v57 = vpop.eup %1761 }
 0x7e3   : > { %939 = vrot.lane.b32.xlu0 %v1762_v57, %s2060_s8 }
 0x7e6   : > { %v1764_v58 = vpop.eup %1763 }
 0x7e7   : > { %937 = vrot.lane.b32.xlu1 %v1764_v58, %s2060_s8 }
 0x855   : > { %v940_v59 = vpop.permute.xlu0 %939 }
 0x856   : > { %v944_v60 = vmul.f32 %v940_v59, %v908_v44 }
 0x858   : > { %952 = vrot.lane.b32.xlu0 %v944_v60, %s2061_s19 }
 0x859   : > { %v938_v61 = vpop.permute.xlu1 %937 }
 0x85a   : > { %v943_v62 = vmul.f32 %v938_v61, %v907_v48 }
 0x85c   : > { %946 = vrot.lane.b32.xlu1 %v943_v62, %s2061_s19 }
 0x8ca   : > { %v953_v63 = vpop.permute.xlu0 %952 }
 0x8cb   : > { %1410 = vst.msk [vmem:[%s2338_s15 + $0x8] sm:$0xff] %vm333_vm2, %v953_v63  ;;  %1558 = vmatmul.mubr.msk.f32.vlgmr.msra.gmra.mrb[6].mxu1 %vm333_vm2, %v953_v63 }
 0x8ce   : > { %v947_v0 = vpop.permute.xlu1 %946 }
 0x8cf   : > { %1409 = vst.msk [vmem:[%s2336_s10 + $0x10] sm:$0xff] %vm333_vm2, %v947_v0  ;;  %1547 = vmatmul.mubr.msk.f32.vlgmr.msra.gmra.mrb[6].mxu0 %vm333_vm2, %v947_v0 }
 0x99e   : > { %v1097_v2 = vpop.f32.mrb[6].mxu1 }
 0x99f   : > { %v1105_v3 = vadd.f32 %v1414_v1, %v1097_v2  ;;  %v1559_v6 = vpop.f32.mrb[7].mxu1 }
 0x9a1   : > { %1765 = vtanh.f32 %v1105_v3  ;;  %v1107_v17 = vmul.f32 0.5, %v1105_v3 }
 0x9a2   : > { %v1025_v8 = vpop.f32.mrb[6].mxu0 }
 0x9a3   : > { %v1104_v11 = vadd.f32 %v1413_v7, %v1025_v8  ;;  %v1548_v12 = vpop.f32.mrb[7].mxu0 }
 0x9a5   : > { %1767 = vtanh.f32 %v1104_v11  ;;  %v1106_v18 = vmul.f32 0.5, %v1104_v11 }
 0x9a6   : > { %1769 = vtanh.f32 %v1107_v17 }
 0x9a7   : > { %1771 = vtanh.f32 %v1106_v18 }
 0x9ab   : > { %v1766_v14 = vpop.eup %1765 }
 0x9ac   : > { %1122 = vrot.lane.b32.xlu0 %v1766_v14, %s2060_s8 }
 0x9af   : > { %v1768_v16 = vpop.eup %1767 }
 0x9b0   : > { %1120 = vrot.lane.b32.xlu1 %v1768_v16, %s2060_s8  ;;  %v1770_v19 = vpop.eup %1769 }
 0x9b1   : > { %v1111_v20 = vadd.f32 1.0, %v1770_v19  ;;  %v1772_v21 = vpop.eup %1771 }
 0x9b2   : > { %v1110_v23 = vadd.f32 1.0, %v1772_v21 }
 0x9b3   : > { %v1113_v22 = vmul.f32 0.5, %v1111_v20 }
 0x9b4   : > { %v1112_v26 = vmul.f32 0.5, %v1110_v23 }
 0x9b5   : > { %v1117_v29 = vmul.f32 %v1113_v22, %v932_v53 }
 0x9b6   : > { %v1116_v32 = vmul.f32 %v1112_v26, %v931_v56 }
 0xa1e   : > { %v1123_v24 = vpop.permute.xlu0 %1122 }
 0xa1f   : > { %v1127_v25 = vmul.f32 %v1123_v24, %v1113_v22 }
 0xa21   : > { %1132 = vrot.lane.b32.xlu0 %v1127_v25, %s2060_s8 }
 0xa22   : > { %v1121_v27 = vpop.permute.xlu1 %1120 }
 0xa23   : > { %v1126_v28 = vmul.f32 %v1121_v27, %v1112_v26 }
 0xa25   : > { %1130 = vrot.lane.b32.xlu1 %v1126_v28, %s2060_s8 }
 0xa93   : > { %v1133_v30 = vpop.permute.xlu0 %1132 }
 0xa94   : > { %v1137_v31 = vadd.f32 %v1133_v30, %v1117_v29 }
 0xa96   : > { %1773 = vtanh.f32 %v1137_v31 }
 0xa97   : > { %v1131_v33 = vpop.permute.xlu1 %1130 }
 0xa98   : > { %v1136_v34 = vadd.f32 %v1131_v33, %v1116_v32 }
 0xa9a   : > { %1775 = vtanh.f32 %v1136_v34 }
 0xaa0   : > { %v1774_v5 = vpop.eup %1773 }
 0xaa1   : > { %1144 = vrot.lane.b32.xlu0 %v1774_v5, %s2060_s8 }
 0xaa4   : > { %v1776_v35 = vpop.eup %1775 }
 0xaa5   : > { %1142 = vrot.lane.b32.xlu1 %v1776_v35, %s2060_s8  ;;  %s1867_s8 = sshll.u32 %s2065_s16, 4  ;;  %s1868_s8 = int_to_ptr.vmem [resolvable:$false] %s1867_s8 }
 0xaa6   : > { %s1869_s21 = scalar_lea.vmem %s1868_s8, 1024  ;;  %p1870_p7 = scmp.lt.s32.totalorder %s2476_s11, %s1868_s8 }
 0xaa7   : > { %p1871_p8 = scmp.lt.s32.totalorder %s1869_s21, %s1863_s12 }
 0xaa9   : > { %p1872_p1 = por %p1871_p8, %p1870_p7 }
 0xaab   : > { %p1873_p11 = pnand %p1872_p1, %p1866_p13 }
 0xb13   : > { %v1145_v36 = vpop.permute.xlu0 %1144 }
 0xb14   : > { %v1149_v37 = vmul.f32 %v1145_v36, %v1113_v22 }
 0xb16   : > { %1157 = vrot.lane.b32.xlu0 %v1149_v37, %s2061_s19 }
 0xb17   : > { %v1143_v38 = vpop.permute.xlu1 %1142 }
 0xb18   : > { %v1148_v39 = vmul.f32 %v1143_v38, %v1112_v26 }
 0xb1a   : > { %1165 = vrot.lane.b32.xlu0 %v1136_v34, %s2062_s17  ;;  %1151 = vrot.lane.b32.xlu1 %v1148_v39, %s2061_s19  ;;  %s2063_s19 = smov [#allocation11]  }
 0xb1e   : > { %1167 = vrot.lane.b32.xlu1 %v1137_v31, %s2062_s17  ;;  %s2483_s17 = sshll.u32 %s2063_s19, 4  ;;  %s2526_s17 = int_to_ptr.vmem [resolvable:$true] %s2483_s17 }
 0xb88   : > { %v1158_v40 = vpop.permute.xlu0 %1157 }
 0xb89   : > { %1160 = vst.msk [vmem:[%s2338_s15] sm:$0xff] %vm333_vm2, %v1158_v40  ;;  %1162 = vst.msk [vmem:[#allocation11 + $0x8] sm:$0xff] %vm333_vm2, %v1158_v40 }
 0xb8a   : > { %1876 = shalt.err (!%p1873_p11)
}
 0xb8b   : > { %s1877_s15 = scalar_lea.hbm %s2474_s13, 512  ;;  %s1881_s18 = scalar_lea.hbm %s2660_s4, 1024 }
 0xb8c   : > { %p1878_p5 = scmp.ne.s32.totalorder %s2474_s13, %s1877_s15  ;;  %p1882_p6 = scmp.lt.u32.totalorder %s2474_s13, %s2660_s4 }
 0xb8d   : > { %p1883_p0 = scmp.lt.u32.totalorder %s1881_s18, %s1877_s15  ;;  %p1885_p12 = scmp.lt.u32.totalorder %s1877_s15, %s2474_s13 }
 0xb8e   : > { %p1879_p9 = pnand %p1878_p5, %p2693_p2 }
 0xb8f   : > { %p1884_p3 = por %p1883_p0, %p1882_p6 }
 0xb90   : > { %p1880_p4 = pneg %p1879_p9 }
 0xb91   : > { %p1886_p10 = por %p1885_p12, %p1884_p3 }
 0xb93   : > { %p1887_p13 = pnand %p1886_p10, %p1880_p4 }
 0xb95   : > { %1890 = shalt.err (!%p1887_p13)
}
 0xb96   : > { %s2066_s21 = smov 128   ;;  %s2067_s12 = smov 8   ;;  %v1166_v41 = vpop.permute.xlu0 %1165  ;;  %v1152_v9 = vpop.permute.xlu1 %1151 }
 0xb97   : > { %1619 = dma.vmem_to_hbm [thread:$0]  (%p2693_p2), %s2476_s11, 512, %s2474_s13, %s2487_s23, %s2066_s21, %s2066_s21, %s2067_s12   ;;  %1171 = vst.msk [vmem:[#allocation12] sm:$0xff] %vm333_vm2, %v1166_v41  ;;  %1161 = vst.msk [vmem:[#allocation11] sm:$0xff] %vm333_vm2, %v1152_v9 }
 0xb98   : > { %s2694_s15 = sshll.u32 %s2138_s28, 9  ;;  %s2695_s16 = sshll.u32 %s2336_s10, 4  ;;  %1415 = vst.msk [vmem:[%s2336_s10 + $0x18] sm:$0xff] %vm333_vm2, %v1152_v9  ;;  %s2523_s16 = int_to_ptr.vmem [resolvable:$true] %s2695_s16 }
 0xb99   : > { %s2519_s18 = scalar_lea.hbm %s2659_s3, %s2694_s15  ;;  %s1174_s14 = scalar_lea.sflag [#allocation4], %s2320_s20 }
 0xb9a   : > { %s1891_s11 = scalar_lea.vmem %s2523_s16, 512  ;;  %p2696_p7 = scmp.ne.s32.totalorder %s2685_s9, 0 }
 0xb9b   : > { %p1892_p2 = scmp.ne.s32.totalorder %s2523_s16, %s1891_s11  ;;  %s2068_s13 = smov [#allocation8]  }
 0xb9c   : > { %s1895_s23 = sshll.u32 %s2068_s13, 4  ;;  %s1896_s23 = int_to_ptr.vmem [resolvable:$false] %s1895_s23 }
 0xb9d   : > { %p1893_p8 = pnand %p1892_p2, %p2696_p7  ;;  %s1897_s8 = scalar_lea.vmem %s1896_s23, 1024 }
 0xb9e   : > { %p1898_p11 = scmp.lt.s32.totalorder %s2523_s16, %s1896_s23  ;;  %p1899_p5 = scmp.lt.s32.totalorder %s1897_s8, %s1891_s11 }
 0xb9f   : > { %p1894_p1 = pneg %p1893_p8 }
 0xba0   : > { %p1900_p9 = por %p1899_p5, %p1898_p11 }
 0xba2   : > { %p1901_p4 = pnand %p1900_p9, %p1894_p1 }
 0xba4   : > { %1904 = shalt.err (!%p1901_p4)
}
 0xba5   : > { %s1905_s10 = scalar_lea.hbm %s2519_s18, 512  ;;  %s1909_s19 = scalar_lea.hbm %s2659_s3, 1024 }
 0xba6   : > { %p1906_p6 = scmp.ne.s32.totalorder %s2519_s18, %s1905_s10  ;;  %p1910_p12 = scmp.lt.u32.totalorder %s2519_s18, %s2659_s3 }
 0xba7   : > { %p1911_p10 = scmp.lt.u32.totalorder %s1909_s19, %s1905_s10  ;;  %p1913_p2 = scmp.lt.u32.totalorder %s1905_s10, %s2519_s18 }
 0xba8   : > { %p1907_p0 = pnand %p1906_p6, %p2696_p7 }
 0xba9   : > { %p1912_p13 = por %p1911_p10, %p1910_p12 }
 0xbaa   : > { %p1908_p3 = pneg %p1907_p0 }
 0xbab   : > { %p1914_p8 = por %p1913_p2, %p1912_p13 }
 0xbad   : > { %p1915_p1 = pnand %p1914_p8, %p1908_p3 }
 0xbaf   : > { %1918 = shalt.err (!%p1915_p1)
}
 0xbb0   : > { %1618 = dma.vmem_to_hbm [thread:$0]  (%p2696_p7), %s2523_s16, 512, %s2519_s18, %s1174_s14, %s2066_s21, %s2066_s21, %s2067_s12  }
 0xbb1   : > { %s1919_s11 = scalar_lea.vmem %s2526_s17, 256  ;;  %p2697_p5 = scmp.eq.s32.totalorder %s2138_s28, 1 }
 0xbb2   : > { %p1920_p11 = scmp.ne.s32.totalorder %s2526_s17, %s1919_s11  ;;  %p1926_p6 = scmp.lt.s32.totalorder %s2526_s17, %s2526_s17 }
 0xbb3   : > { %p1927_p0 = scmp.lt.s32.totalorder %s1919_s11, %s1919_s11 }
 0xbb4   : > { %p1921_p9 = pnand %p1920_p11, %p2697_p5 }
 0xbb5   : > { %p1928_p3 = por %p1927_p0, %p1926_p6 }
 0xbb6   : > { %p1922_p4 = pneg %p1921_p9 }
 0xbb8   : > { %p1929_p12 = pnand %p1928_p3, %p1922_p4 }
 0xbba   : > { %1932 = shalt.err (!%p1929_p12)
}
 0xbbb   : > { %s1933_s8 = scalar_lea.hbm %s2661_s5, 256  ;;  %p2698_p10 = pmov %p2697_p5 }
 0xbbc   : > { %p1934_p7 = scmp.ne.s32.totalorder %s2661_s5, %s1933_s8  ;;  %p1939_p8 = scmp.lt.u32.totalorder %s1933_s8, %s2661_s5 }
 0xbbe   : > { %p1935_p13 = pnand %p1934_p7, %p2698_p10 }
 0xbc0   : > { %p1936_p2 = pneg %p1935_p13 }
 0xbc2   : > { %p1941_p1 = pnand %p1939_p8, %p1936_p2 }
 0xbc4   : > { %1944 = shalt.err (!%p1941_p1)
}
 0xbc5   : > { %p2699_p11 = pmov %p2697_p5  ;;  %v1168_v13 = vpop.permute.xlu1 %1167  ;;  %s1945_s19 = scalar_lea.vmem %s2533_s0, 256 }
 0xbc6   : > { %1172 = vst.msk [vmem:[#allocation12 + $0x8] sm:$0xff] %vm333_vm2, %v1168_v13  ;;  %p1946_p5 = scmp.ne.s32.totalorder %s2533_s0, %s1945_s19  ;;  %p2700_p9 = pmov %p2698_p10 }
 0xbc7   : > { %1621 = dma.vmem_to_hbm [thread:$0]  (%p2699_p11), %s2526_s17, 256, %s2661_s5, [#allocation10], %s2066_s21, %s2066_s21, %s2067_s12  }
 0xbc8   : > { %p1947_p4 = pnand %p1946_p5, %p2700_p9  ;;  %p1952_p0 = scmp.lt.s32.totalorder %s2533_s0, %s2533_s0 }
 0xbc9   : > { %p1953_p3 = scmp.lt.s32.totalorder %s1945_s19, %s1945_s19 }
 0xbca   : > { %p1948_p6 = pneg %p1947_p4 }
 0xbcb   : > { %p1954_p12 = por %p1953_p3, %p1952_p0 }
 0xbcd   : > { %p1955_p7 = pnand %p1954_p12, %p1948_p6 }
 0xbcf   : > { %1958 = shalt.err (!%p1955_p7)
}
 0xbd0   : > { %s1959_s11 = scalar_lea.hbm %s2662_s6, 256  ;;  %p2701_p13 = pmov %p2700_p9 }
 0xbd1   : > { %p1960_p10 = scmp.ne.s32.totalorder %s2662_s6, %s1959_s11  ;;  %p1965_p1 = scmp.lt.u32.totalorder %s1959_s11, %s2662_s6 }
 0xbd3   : > { %p1961_p2 = pnand %p1960_p10, %p2701_p13 }
 0xbd5   : > { %p1962_p8 = pneg %p1961_p2 }
 0xbd7   : > { %p1967_p11 = pnand %p1965_p1, %p1962_p8 }
 0xbd9   : > { %1970 = shalt.err (!%p1967_p11)
}
 0xbda   : > { %p2702_p5 = pmov %p2700_p9 }
 0xbdc   : > { %1623 = dma.vmem_to_hbm [thread:$0]  (%p2702_p5), %s2533_s0, 256, %s2662_s6, [#allocation13], %s2066_s21, %s2066_s21, %s2067_s12  }
 0xbdd   : > { %p2703_p9 = pmov %p2702_p5 }
 0xbde   : > { %p2704_p4 = pmov %p2702_p5 }
 0xbdf   : > { %2008 = dma.done.wait (%p2703_p9), [#allocation10], 256  }
 0xbe0   : > { %2010 = vsyncadd (%p2704_p4), [#allocation10], 4294967040  ;;  %p2705_p6 = pmov %p2704_p4 }
 0xbe1   : > { %p2706_p0 = pmov %p2704_p4 }
 0xbe2   : > { %2012 = dma.done.wait (%p2705_p6), [#allocation13], 256  }
 0xbe3   : > { %2014 = vsyncadd (%p2706_p0), [#allocation13], 4294967040 }
 0xbe4 PF: > { %s2707_s18 = sld [smem:[#allocation21_spill]]  ;;  %s1258_s16 = sand.u32 1, %s2037_s24  }
 0xbe5   : > { %p2709_p12 = scmp.ge.s32.totalorder %s2049_s27, 2  ;;  %s1259_s0 = scalar_lea.sflag [#allocation4], %s1258_s16 }
 0xbea   : > { %p2708_p3 = scmp.ne.s32.totalorder %s2707_s18, 0 }
 0xbec   : > { %p1642_p7 = pnand %p2709_p12, %p2708_p3 }
 0xbee   : > { %2016 = dma.done.wait (!%p1642_p7), %s1259_s0, 512  }
 0xbef   : > { %2018 = vsyncadd (!%p1642_p7), %s1259_s0, 4294966784  ;;  %s2710_s21 = sadd.s32 4294967294, %s2049_s27   ;;  %s2711_s12 = sld [smem:[#allocation23_spill]] }
 0xbf0   : > { %s1267_s14 = sand.u32 1, %s2710_s21   ;;  %p2713_p13 = pmov %p2709_p12 }
 0xbf1   : > { %s1268_s28 = scalar_lea.sflag [#allocation10], %s1267_s14 }
 0xbf5   : > { %p2712_p10 = scmp.ne.s32.totalorder %s2711_s12, 0 }
 0xbf7   : > { %p1645_p2 = pnand %p2713_p13, %p2712_p10 }
 0xbf9   : > { %2020 = dma.done.wait (!%p1645_p2), %s1268_s28, 512  }
 0xbfa   : > { %2022 = vsyncadd (!%p1645_p2), %s1268_s28, 4294966784  ;;  %s2714_s24 = sld [smem:[#allocation20_spill]]  ;;  %s2715_s23 = sld [smem:[#allocation22_spill]] }
 0xbfb   : > { %p25_p8 = scmp.ge.s32.totalorder %s2142_s30, 4   ;;  %s2716_s21 = smov %s2029_s22 }
 0xbfc   : > { %s2721_s27 = smov %s2142_s30 }
 0xbfd   :  { %27 = sbr.rel (!%p25_p8) target bundleno = 13 (0xd), region = 131 }
 0xc00   : > { %s2717_s22 = smov %s2714_s24  ;;  %s2718_s24 = smov %s2041_s25 }
 0xc01   : > { %s2719_s25 = smov %s2045_s26  ;;  %s2720_s26 = smov %s2265_s7 }
 0xc04   :  { %1273 = vsyncpa [#allocation3], 1 }
 0xc05   :  { %1275 = vsyncpa [#allocation3 + $0x1], 1 }
 0xc06   :  { %1276 = vsyncpa [#allocation6], 1 }
 0xc07   :  { %1277 = vsyncpa [#allocation4], 1 }
 0xc08   :  { %1279 = vsyncpa [#allocation4 + $0x1], 1 }
 0xc09   :  { %1280 = vsyncpa [#allocation10], 1 }
 0xc0a   :  { %1282 = vsyncpa [#allocation10 + $0x1], 1 }
 0xc0b   :  { %1283 = vsyncpa [#allocation13], 1 }

</bundles_post_ra>
